<compile_context>
chip_gen: v7x
topology: tpu7x:2x2x1
jax: 0.10.0
libtpu: 0.0.40
codegen_flags: <defaults>
</compile_context>

<pallas_src>
import jax
import jax.numpy as jnp
from jax.experimental import pallas as pl
from jax.experimental.pallas import tpu as pltpu

N_NODES = 19       # EEG electrodes
IN_CH   = 1025     # GIN in_channels
HID     = 256      # GIN hidden_channels
OUT_CH  = 512      # GIN out_channels
N_PAD   = 32       # nodes padded to a multiple of 8
IN_PAD  = 1152     # 1025 padded to a multiple of 128 (9 * 128)


def _classifier_kernel(adj_ref, x_ref,
                       w1a_ref, b1a_ref, w1b_ref, b1b_ref,
                       w2a_ref, b2a_ref, m_ref, bias_ref, out_ref):
    adj = adj_ref[...]                                    # (N_PAD, N_PAD)  bf16, = A + I
    x   = x_ref[...]                                      # (N_PAD, IN_PAD) bf16

    # ---- GIN layer 1:  h = relu( (A+I) @ (x @ w1a) + b1a ); h = relu(h @ w1b + b1b) ----
    xw = jnp.dot(x, w1a_ref[...], preferred_element_type=jnp.float32)       # (N_PAD, HID)
    h  = jnp.dot(adj, xw.astype(jnp.bfloat16),
                 preferred_element_type=jnp.float32) + b1a_ref[...]
    h  = jnp.maximum(h, 0.0)
    h  = jnp.dot(h.astype(jnp.bfloat16), w1b_ref[...],
                 preferred_element_type=jnp.float32) + b1b_ref[...]
    h  = jnp.maximum(h, 0.0)                              # inter-layer activation

    # ---- GIN layer 2, first linear + ReLU:  relu_h = relu( (A+I) @ (h @ w2a) + b2a ) ----
    hw = jnp.dot(h.astype(jnp.bfloat16), w2a_ref[...],
                 preferred_element_type=jnp.float32)                        # (N_PAD, HID)
    relu_h = jnp.dot(adj, hw.astype(jnp.bfloat16),
                     preferred_element_type=jnp.float32) + b2a_ref[...]
    relu_h = jnp.maximum(relu_h, 0.0)

    # ---- fused (second linear of MLP2) + predictor + sigmoid ----
    # logit = sum(relu_h * M) + bias_fused, with M = wp @ w2b.T (rows 19..31 zero)
    prod  = relu_h * m_ref[...].astype(jnp.float32)                         # (N_PAD, HID)
    logit = jnp.sum(prod, axis=(0, 1), keepdims=True) + bias_ref[...]       # (1, 1)
    out_ref[...] = jax.nn.sigmoid(logit)


def connectivity_classifier_batched(x_b, adj_b, params):
    """x_b: (B, N_PAD, IN_PAD) bf16, adj_b: (B, N_PAD, N_PAD) bf16 (= A + I, edge-weighted)."""
    B = x_b.shape[0]
    w1a, b1a = params["w1a"], params["b1a"]
    w1b, b1b = params["w1b"], params["b1b"]
    w2a, b2a = params["w2a"], params["b2a"]
    m, bias = params["m"], params["bias"]

    def const_spec(arr):
        # Full-array block, constant index_map: DMA'd once, VMEM-resident across grid steps.
        return pl.BlockSpec(arr.shape, lambda b, _nd=arr.ndim: (0,) * _nd)

    return pl.pallas_call(
        _classifier_kernel,
        out_shape=jax.ShapeDtypeStruct((B, 1, 1), jnp.float32),
        grid=(B,),
        in_specs=[
            pl.BlockSpec((pl.Squeezed(), N_PAD, N_PAD), lambda b: (b, 0, 0)),   # adj
            pl.BlockSpec((pl.Squeezed(), N_PAD, IN_PAD), lambda b: (b, 0, 0)),  # x
            const_spec(w1a), const_spec(b1a),
            const_spec(w1b), const_spec(b1b),
            const_spec(w2a), const_spec(b2a),
            const_spec(m), const_spec(bias),
        ],
        out_specs=pl.BlockSpec((pl.Squeezed(), 1, 1), lambda b: (b, 0, 0)),
        compiler_params=pltpu.CompilerParams(
            dimension_semantics=("parallel",),          # v7x: shard batch across both TCs
            vmem_limit_bytes=16 << 20),
    )(adj_b, x_b, w1a, b1a, w1b, b1b, w2a, b2a, m, bias)


def _build_adjacency(edge_index, pred_connectivity):
    """Weighted adjacency with self loops at padded size: adj = edge_mask * pred + I (bf16)."""
    src, dst = edge_index[0], edge_index[1]
    mask = jnp.zeros((N_PAD, N_PAD), jnp.float32).at[dst, src].set(1.0)
    pred = jnp.zeros((N_PAD, N_PAD), jnp.float32).at[:N_NODES, :N_NODES].set(
        pred_connectivity.astype(jnp.float32))
    eye = jnp.eye(N_PAD, dtype=jnp.float32)
    return (mask * pred + eye).astype(jnp.bfloat16)


def _pad_x(x):
    return jnp.zeros((N_PAD, IN_PAD), jnp.bfloat16).at[:N_NODES, :IN_CH].set(
        x.astype(jnp.bfloat16))


def connectivity_classifier(x, edge_index, pred_connectivity, params):
    """x: (19, 1025) f32, edge_index: (2, E) i32, pred_connectivity: (19, 19) f32."""
    adj = _build_adjacency(edge_index, pred_connectivity)
    x_p = _pad_x(x)
    out = connectivity_classifier_batched(x_p[None], adj[None], params)
    return out.reshape(1)   # matches torch output shape (1,)


def init_params(key):
    """PyTorch-style uniform(-1/sqrt(fan_in), 1/sqrt(fan_in)) init + offline predictor fusion."""
    ks = jax.random.split(key, 10)

    def lin(k, fan_in, shape):
        bound = 1.0 / float(fan_in) ** 0.5
        return jax.random.uniform(k, shape, jnp.float32, -bound, bound)

    # GIN layer 1 MLP: 1025 -> 256 -> 256   (weights stored bf16, biases f32)
    w1a = (jnp.zeros((IN_PAD, HID), jnp.float32)
           .at[:IN_CH, :].set(lin(ks[0], IN_CH, (IN_CH, HID)))).astype(jnp.bfloat16)
    b1a = lin(ks[1], IN_CH, (1, HID))
    w1b = lin(ks[2], HID, (HID, HID)).astype(jnp.bfloat16)
    b1b = lin(ks[3], HID, (1, HID))
    # GIN layer 2 MLP: 256 -> 256 -> 512
    w2a = lin(ks[4], HID, (HID, HID)).astype(jnp.bfloat16)
    b2a = lin(ks[5], HID, (1, HID))
    w2b = lin(ks[6], HID, (HID, OUT_CH))          # f32, folded into M below
    b2b = lin(ks[7], HID, (1, OUT_CH))            # folded into fused bias below
    # predictor: Linear(19*512, 1); weight reshaped to (19, 512), node-padded to (32, 512)
    wp_flat = lin(ks[8], N_NODES * OUT_CH, (N_NODES, OUT_CH))
    bp = lin(ks[9], N_NODES * OUT_CH, (1, 1))
    wp = jnp.zeros((N_PAD, OUT_CH), jnp.float32).at[:N_NODES, :].set(wp_flat)

    # Fusion invariant: rows N_NODES..N_PAD-1 of wp MUST be zero so M has zero rows there
    # (padded-row garbage never reaches the logit).  Guard future weight-loading paths.
    assert bool(jnp.all(wp[N_NODES:] == 0.0)), "predictor weight padding rows must be zero"

    # ---- offline fusion of w2b/b2b/wp/bp (exact: no nonlinearity after w2b) ----
    #   logit = sum_n (relu_h[n] @ w2b + b2b) · wp[n] + bp
    #         = sum_n relu_h[n] · (wp[n] @ w2b.T)  +  b2b · sum_n wp[n]  +  bp
    m_fused = (wp @ w2b.T).astype(jnp.bfloat16)                  # (N_PAD, HID), rows 19..31 == 0
    bias_fused = (jnp.sum(b2b * jnp.sum(wp, axis=0, keepdims=True)) + bp[0, 0]).reshape(1, 1)

    return dict(w1a=w1a, b1a=b1a, w1b=w1b, b1b=b1b,
                w2a=w2a, b2a=b2a, m=m_fused, bias=bias_fused)


if __name__ == "__main__":
    key = jax.random.PRNGKey(0)
    kx, kc, kp = jax.random.split(key, 3)

    # Example inputs implied by the forward pass: 19-node EEG graph, 1025-dim features.
    x = jax.random.normal(kx, (N_NODES, IN_CH), jnp.float32)
    pred_connectivity = jax.random.uniform(kc, (N_NODES, N_NODES), jnp.float32)

    # Fully connected edge_index (no self loops), PyG convention: row 0 = source, row 1 = target.
    src = jnp.repeat(jnp.arange(N_NODES), N_NODES)
    dst = jnp.tile(jnp.arange(N_NODES), N_NODES)
    keep = src != dst
    edge_index = jnp.stack([src[keep], dst[keep]]).astype(jnp.int32)

    params = init_params(kp)

    # Single-sample forward (matches the torch module: output shape (1,)).
    fwd = jax.jit(connectivity_classifier)
    pred_dem = fwd(x, edge_index, pred_connectivity, params)
    jax.block_until_ready(pred_dem)
    assert pred_dem.shape == (1,)
    assert bool(jnp.isfinite(pred_dem).all())

    # Batched path: weights DMA'd once and held VMEM-resident across grid=(B,) steps.
    B = 4
    xs = jax.random.normal(jax.random.PRNGKey(1), (B, N_NODES, IN_CH), jnp.float32)
    preds = jax.random.uniform(jax.random.PRNGKey(2), (B, N_NODES, N_NODES), jnp.float32)
    adj_b = jnp.stack([_build_adjacency(edge_index, preds[b]) for b in range(B)])
    x_b = jnp.stack([_pad_x(xs[b]) for b in range(B)])
    out_b = jax.jit(connectivity_classifier_batched)(x_b, adj_b, params)
    jax.block_until_ready(out_b)
    assert out_b.shape == (B, 1, 1)
    assert bool(jnp.isfinite(out_b).all())
    # Cross-check batched sample 0 against the single-sample path.
    single0 = fwd(xs[0], edge_index, preds[0], params)
    assert bool(jnp.allclose(out_b[0].reshape(1), single0, atol=1e-5))

    print("KERNEL_OK")
</pallas_src>

<mosaic_0001>
module attributes {stable_mosaic.version = 11 : i64} {
  func.func @_classifier_kernel(%arg0: i32, %arg1: memref<1x32x32xbf16, #tpu.memory_space<vmem>>, %arg2: memref<1x32x1152xbf16, #tpu.memory_space<vmem>>, %arg3: memref<1152x256xbf16, #tpu.memory_space<vmem>>, %arg4: memref<1x256xf32, #tpu.memory_space<vmem>>, %arg5: memref<256x256xbf16, #tpu.memory_space<vmem>>, %arg6: memref<1x256xf32, #tpu.memory_space<vmem>>, %arg7: memref<256x256xbf16, #tpu.memory_space<vmem>>, %arg8: memref<1x256xf32, #tpu.memory_space<vmem>>, %arg9: memref<32x256xbf16, #tpu.memory_space<vmem>>, %arg10: memref<1x1xf32, #tpu.memory_space<vmem>>, %arg11: memref<1x1x1xf32, #tpu.memory_space<vmem>>) attributes {dimension_semantics = [#tpu.dimension_semantics<parallel>], iteration_bounds = array<i64: 1>, scalar_prefetch = 0 : i64, scratch_operands = 0 : i64, tpu.core_type = #tpu.core_type<tc>, window_params = [{transform_indices = @transform_0, window_bounds = array<i64: 1, 32, 32>}, {transform_indices = @transform_1, window_bounds = array<i64: 1, 32, 1152>}, {pipeline_mode = #tpu.pipeline_mode<synchronous>, transform_indices = @transform_2, window_bounds = array<i64: 1152, 256>}, {pipeline_mode = #tpu.pipeline_mode<synchronous>, transform_indices = @transform_3, window_bounds = array<i64: 1, 256>}, {pipeline_mode = #tpu.pipeline_mode<synchronous>, transform_indices = @transform_4, window_bounds = array<i64: 256, 256>}, {pipeline_mode = #tpu.pipeline_mode<synchronous>, transform_indices = @transform_5, window_bounds = array<i64: 1, 256>}, {pipeline_mode = #tpu.pipeline_mode<synchronous>, transform_indices = @transform_6, window_bounds = array<i64: 256, 256>}, {pipeline_mode = #tpu.pipeline_mode<synchronous>, transform_indices = @transform_7, window_bounds = array<i64: 1, 256>}, {pipeline_mode = #tpu.pipeline_mode<synchronous>, transform_indices = @transform_8, window_bounds = array<i64: 32, 256>}, {pipeline_mode = #tpu.pipeline_mode<synchronous>, transform_indices = @transform_9, window_bounds = array<i64: 1, 1>}, {transform_indices = @transform_10, window_bounds = array<i64: 1, 1, 1>}]} {
    %c0 = arith.constant 0 : index
    %c0_0 = arith.constant 0 : index
    %c0_1 = arith.constant 0 : index
    %0 = vector.load %arg1[%c0, %c0_0, %c0_1] : memref<1x32x32xbf16, #tpu.memory_space<vmem>>, vector<1x32x32xbf16>
    %1 = vector.shape_cast %0 : vector<1x32x32xbf16> to vector<32x32xbf16>
    %c0_2 = arith.constant 0 : index
    %c0_3 = arith.constant 0 : index
    %c0_4 = arith.constant 0 : index
    %2 = vector.load %arg2[%c0_2, %c0_3, %c0_4] : memref<1x32x1152xbf16, #tpu.memory_space<vmem>>, vector<1x32x1152xbf16>
    %3 = vector.shape_cast %2 : vector<1x32x1152xbf16> to vector<32x1152xbf16>
    %c0_5 = arith.constant 0 : index
    %c0_6 = arith.constant 0 : index
    %4 = vector.load %arg3[%c0_5, %c0_6] : memref<1152x256xbf16, #tpu.memory_space<vmem>>, vector<1152x256xbf16>
    %cst = arith.constant dense<0.000000e+00> : vector<32x256xf32>
    %5 = tpu.matmul %3, %4, %cst {dimension_numbers = #tpu.dot_dimension_numbers<[1], [0], [0], [1], [0, 0, 1, 1], [], []>} : vector<32x1152xbf16>, vector<1152x256xbf16>, vector<32x256xf32> -> vector<32x256xf32>
    %6 = arith.truncf %5 : vector<32x256xf32> to vector<32x256xbf16>
    %cst_7 = arith.constant dense<0.000000e+00> : vector<32x256xf32>
    %7 = tpu.matmul %1, %6, %cst_7 {dimension_numbers = #tpu.dot_dimension_numbers<[1], [0], [0], [1], [0, 0, 1, 1], [], []>} : vector<32x32xbf16>, vector<32x256xbf16>, vector<32x256xf32> -> vector<32x256xf32>
    %c0_8 = arith.constant 0 : index
    %c0_9 = arith.constant 0 : index
    %8 = vector.load %arg4[%c0_8, %c0_9] : memref<1x256xf32, #tpu.memory_space<vmem>>, vector<1x256xf32>
    %9 = vector.broadcast %8 : vector<1x256xf32> to vector<32x256xf32>
    %10 = arith.addf %7, %9 : vector<32x256xf32>
    %cst_10 = arith.constant 0.000000e+00 : f32
    %11 = vector.broadcast %cst_10 : f32 to vector<32x256xf32>
    %12 = arith.maximumf %10, %11 : vector<32x256xf32>
    %13 = arith.truncf %12 : vector<32x256xf32> to vector<32x256xbf16>
    %c0_11 = arith.constant 0 : index
    %c0_12 = arith.constant 0 : index
    %14 = vector.load %arg5[%c0_11, %c0_12] : memref<256x256xbf16, #tpu.memory_space<vmem>>, vector<256x256xbf16>
    %cst_13 = arith.constant dense<0.000000e+00> : vector<32x256xf32>
    %15 = tpu.matmul %13, %14, %cst_13 {dimension_numbers = #tpu.dot_dimension_numbers<[1], [0], [0], [1], [0, 0, 1, 1], [], []>} : vector<32x256xbf16>, vector<256x256xbf16>, vector<32x256xf32> -> vector<32x256xf32>
    %c0_14 = arith.constant 0 : index
    %c0_15 = arith.constant 0 : index
    %16 = vector.load %arg6[%c0_14, %c0_15] : memref<1x256xf32, #tpu.memory_space<vmem>>, vector<1x256xf32>
    %17 = vector.broadcast %16 : vector<1x256xf32> to vector<32x256xf32>
    %18 = arith.addf %15, %17 : vector<32x256xf32>
    %cst_16 = arith.constant 0.000000e+00 : f32
    %19 = vector.broadcast %cst_16 : f32 to vector<32x256xf32>
    %20 = arith.maximumf %18, %19 : vector<32x256xf32>
    %21 = arith.truncf %20 : vector<32x256xf32> to vector<32x256xbf16>
    %c0_17 = arith.constant 0 : index
    %c0_18 = arith.constant 0 : index
    %22 = vector.load %arg7[%c0_17, %c0_18] : memref<256x256xbf16, #tpu.memory_space<vmem>>, vector<256x256xbf16>
    %cst_19 = arith.constant dense<0.000000e+00> : vector<32x256xf32>
    %23 = tpu.matmul %21, %22, %cst_19 {dimension_numbers = #tpu.dot_dimension_numbers<[1], [0], [0], [1], [0, 0, 1, 1], [], []>} : vector<32x256xbf16>, vector<256x256xbf16>, vector<32x256xf32> -> vector<32x256xf32>
    %24 = arith.truncf %23 : vector<32x256xf32> to vector<32x256xbf16>
    %cst_20 = arith.constant dense<0.000000e+00> : vector<32x256xf32>
    %25 = tpu.matmul %1, %24, %cst_20 {dimension_numbers = #tpu.dot_dimension_numbers<[1], [0], [0], [1], [0, 0, 1, 1], [], []>} : vector<32x32xbf16>, vector<32x256xbf16>, vector<32x256xf32> -> vector<32x256xf32>
    %c0_21 = arith.constant 0 : index
    %c0_22 = arith.constant 0 : index
    %26 = vector.load %arg8[%c0_21, %c0_22] : memref<1x256xf32, #tpu.memory_space<vmem>>, vector<1x256xf32>
    %27 = vector.broadcast %26 : vector<1x256xf32> to vector<32x256xf32>
    %28 = arith.addf %25, %27 : vector<32x256xf32>
    %cst_23 = arith.constant 0.000000e+00 : f32
    %29 = vector.broadcast %cst_23 : f32 to vector<32x256xf32>
    %30 = arith.maximumf %28, %29 : vector<32x256xf32>
    %c0_24 = arith.constant 0 : index
    %c0_25 = arith.constant 0 : index
    %31 = vector.load %arg9[%c0_24, %c0_25] : memref<32x256xbf16, #tpu.memory_space<vmem>>, vector<32x256xbf16>
    %32 = arith.extf %31 : vector<32x256xbf16> to vector<32x256xf32>
    %33 = arith.mulf %30, %32 : vector<32x256xf32>
    %34 = vector.shape_cast %33 : vector<32x256xf32> to vector<1x32x256xf32>
    %cst_26 = arith.constant dense<0.000000e+00> : vector<1xf32>
    %35 = vector.multi_reduction <add>, %34, %cst_26 [1, 2] : vector<1x32x256xf32> to vector<1xf32>
    %36 = vector.shape_cast %35 : vector<1xf32> to vector<1x1x1xf32>
    %37 = vector.extract %36[0, 0, 0] : f32 from vector<1x1x1xf32>
    %38 = vector.broadcast %37 : f32 to vector<1x1xf32>
    %c0_27 = arith.constant 0 : index
    %c0_28 = arith.constant 0 : index
    %39 = vector.load %arg10[%c0_27, %c0_28] : memref<1x1xf32, #tpu.memory_space<vmem>>, vector<1x1xf32>
    %40 = arith.addf %38, %39 : vector<1x1xf32>
    %41 = arith.negf %40 : vector<1x1xf32>
    %42 = math.exp %41 : vector<1x1xf32>
    %cst_29 = arith.constant 1.000000e+00 : f32
    %43 = vector.broadcast %cst_29 : f32 to vector<1x1xf32>
    %44 = arith.addf %43, %42 : vector<1x1xf32>
    %45 = arith.divf %43, %44 : vector<1x1xf32>
    %c0_30 = arith.constant 0 : index
    %c0_31 = arith.constant 0 : index
    %c0_32 = arith.constant 0 : index
    %46 = vector.load %arg11[%c0_30, %c0_31, %c0_32] : memref<1x1x1xf32, #tpu.memory_space<vmem>>, vector<1x1x1xf32>
    %47 = vector.shape_cast %46 : vector<1x1x1xf32> to vector<1x1xf32>
    %48 = vector.shape_cast %45 : vector<1x1xf32> to vector<1x1x1xf32>
    tpu.vector_store %arg11[%c0_30, %c0_31, %c0_32], %48 {strides = array<i32>} : memref<1x1x1xf32, #tpu.memory_space<vmem>>, vector<1x1x1xf32>,
    return
  }
  func.func @transform_0(%arg0: i32) -> (i32, i32, i32) {
    %c0_i32 = arith.constant 0 : i32
    %c0_i32_0 = arith.constant 0 : i32
    %c0_i32_1 = arith.constant 0 : i32
    return %arg0, %c0_i32, %c0_i32_0 : i32, i32, i32
  }
  func.func @transform_1(%arg0: i32) -> (i32, i32, i32) {
    %c0_i32 = arith.constant 0 : i32
    %c0_i32_0 = arith.constant 0 : i32
    %c0_i32_1 = arith.constant 0 : i32
    return %arg0, %c0_i32, %c0_i32_0 : i32, i32, i32
  }
  func.func @transform_2(%arg0: i32) -> (i32, i32) {
    %c0_i32 = arith.constant 0 : i32
    %c0_i32_0 = arith.constant 0 : i32
    %c0_i32_1 = arith.constant 0 : i32
    return %c0_i32, %c0_i32_0 : i32, i32
  }
  func.func @transform_3(%arg0: i32) -> (i32, i32) {
    %c0_i32 = arith.constant 0 : i32
    %c0_i32_0 = arith.constant 0 : i32
    %c0_i32_1 = arith.constant 0 : i32
    return %c0_i32, %c0_i32_0 : i32, i32
  }
  func.func @transform_4(%arg0: i32) -> (i32, i32) {
    %c0_i32 = arith.constant 0 : i32
    %c0_i32_0 = arith.constant 0 : i32
    %c0_i32_1 = arith.constant 0 : i32
    return %c0_i32, %c0_i32_0 : i32, i32
  }
  func.func @transform_5(%arg0: i32) -> (i32, i32) {
    %c0_i32 = arith.constant 0 : i32
    %c0_i32_0 = arith.constant 0 : i32
    %c0_i32_1 = arith.constant 0 : i32
    return %c0_i32, %c0_i32_0 : i32, i32
  }
  func.func @transform_6(%arg0: i32) -> (i32, i32) {
    %c0_i32 = arith.constant 0 : i32
    %c0_i32_0 = arith.constant 0 : i32
    %c0_i32_1 = arith.constant 0 : i32
    return %c0_i32, %c0_i32_0 : i32, i32
  }
  func.func @transform_7(%arg0: i32) -> (i32, i32) {
    %c0_i32 = arith.constant 0 : i32
    %c0_i32_0 = arith.constant 0 : i32
    %c0_i32_1 = arith.constant 0 : i32
    return %c0_i32, %c0_i32_0 : i32, i32
  }
  func.func @transform_8(%arg0: i32) -> (i32, i32) {
    %c0_i32 = arith.constant 0 : i32
    %c0_i32_0 = arith.constant 0 : i32
    %c0_i32_1 = arith.constant 0 : i32
    return %c0_i32, %c0_i32_0 : i32, i32
  }
  func.func @transform_9(%arg0: i32) -> (i32, i32) {
    %c0_i32 = arith.constant 0 : i32
    %c0_i32_0 = arith.constant 0 : i32
    %c0_i32_1 = arith.constant 0 : i32
    return %c0_i32, %c0_i32_0 : i32, i32
  }
  func.func @transform_10(%arg0: i32) -> (i32, i32, i32) {
    %c0_i32 = arith.constant 0 : i32
    %c0_i32_0 = arith.constant 0 : i32
    %c0_i32_1 = arith.constant 0 : i32
    return %arg0, %c0_i32, %c0_i32_0 : i32, i32, i32
  }
}

</mosaic_0001>

<bundles_post_ra>
// kernel: connectivity_classifier.1
= control target key start
LH: loop header
LB: loop body
LE: loop exit
PB: predicated region body
PF: predicated region fallthrough
CT: control target
= control target key end

     0   :  { %s3476_s0 = inlined_call_operand.vmem [shape: bf16[1,32,32], index: 0, kind: input, shape index: {}]   ;;  %s3477_s1 = inlined_call_operand.vmem [shape: bf16[1,32,1152], index: 1, kind: input, shape index: {}]   ;;  %s3478_s2 = inlined_call_operand.vmem [shape: bf16[1152,256], index: 2, kind: input, shape index: {}]   ;;  %s3479_s3 = inlined_call_operand.vmem [shape: f32[1,256], index: 3, kind: input, shape index: {}]   ;;  %s3480_s4 = inlined_call_operand.vmem [shape: bf16[256,256], index: 4, kind: input, shape index: {}]   ;;  %s3481_s5 = inlined_call_operand.vmem [shape: f32[1,256], index: 5, kind: input, shape index: {}]   ;;  %s3482_s6 = inlined_call_operand.vmem [shape: bf16[256,256], index: 6, kind: input, shape index: {}]   ;;  %s3483_s7 = inlined_call_operand.vmem [shape: f32[1,256], index: 7, kind: input, shape index: {}]   ;;  %s3484_s8 = inlined_call_operand.vmem [shape: bf16[32,256], index: 8, kind: input, shape index: {}]   ;;  %s3485_s9 = inlined_call_operand.<no memory space> [shape: f32[1,1], index: 9, kind: input, shape index: {}]   ;;  %s3486_s10 = inlined_call_operand.hbm [shape: f32[1,1,1], index: 10, kind: output, shape index: {}]  }
   0x1   :  { %v15_v0 = vstv %s3485_s9 }
   0x2   :  { %16 = vst [vmem:[#allocation2] sm:$0x1] %v15_v0 }
   0x3   :  { %v2303_v1 = vld [vmem:[%s3478_s2 + $0x104] ss:$8 sps:$4 sm:$0xff]   ;;  %v2305_v2 = vld [vmem:[%s3478_s2 + $0x100] ss:$8 sps:$4 sm:$0xff]   ;;  %v2306_v3 = vld [vmem:[%s3478_s2 + $0x114] ss:$8 sps:$4 sm:$0xff]  }
   0x4   :  { %1072 = vmatprep.subr.bf16.mxu0 %v2303_v1  ;;  %v2308_v4 = vld [vmem:[%s3478_s2 + $0x110] ss:$8 sps:$4 sm:$0xff]   ;;  %v2309_v5 = vld [vmem:[%s3478_s2 + $0x124] ss:$8 sps:$4 sm:$0xff]   ;;  %v2311_v6 = vld [vmem:[%s3478_s2 + $0x120] ss:$8 sps:$4 sm:$0xff]  }
   0x5   :  { %1073 = vmatpush1.bf16.msra.mxu0 %v2305_v2  ;;  %v2312_v7 = vld [vmem:[%s3478_s2 + $0x134] ss:$8 sps:$4 sm:$0xff]   ;;  %v2314_v8 = vld [vmem:[%s3478_s2 + $0x130] ss:$8 sps:$4 sm:$0xff]   ;;  %v2315_v9 = vld [vmem:[%s3478_s2 + $0x144] ss:$8 sps:$4 sm:$0xff]  }
   0x6   :  { %1074 = vmatprep.subr.bf16.mxu0 %v2306_v3  ;;  %v2317_v10 = vld [vmem:[%s3478_s2 + $0x140] ss:$8 sps:$4 sm:$0xff]   ;;  %v2318_v11 = vld [vmem:[%s3478_s2 + $0x154] ss:$8 sps:$4 sm:$0xff]   ;;  %v2320_v12 = vld [vmem:[%s3478_s2 + $0x150] ss:$8 sps:$4 sm:$0xff]  }
   0x7   :  { %v2321_v13 = vld [vmem:[%s3478_s2 + $0x164] ss:$8 sps:$4 sm:$0xff]   ;;  %v2323_v15 = vld [vmem:[%s3478_s2 + $0x160] ss:$8 sps:$4 sm:$0xff]   ;;  %v2324_v16 = vld [vmem:[%s3478_s2 + $0x174] ss:$8 sps:$4 sm:$0xff]  }
   0x8   :  { %v2353_v14 = vld [vmem:[%s3477_s1 + $0xc] ss:$36 sps:$4 sm:$0xff]   ;;  %v2329_v19 = vld [vmem:[%s3478_s2 + $0x180] ss:$8 sps:$4 sm:$0xff]   ;;  %v2330_v20 = vld [vmem:[%s3478_s2 + $0x194] ss:$8 sps:$4 sm:$0xff]  }
   0x9   :  { %1075 = vmatpush1.bf16.msra.mxu0 %v2308_v4  ;;  %1104 = vmatprep.mubr.bf16.mxu0 %v2353_v14  ;;  %v2326_v17 = vld [vmem:[%s3478_s2 + $0x170] ss:$8 sps:$4 sm:$0xff]   ;;  %v2327_v18 = vld [vmem:[%s3478_s2 + $0x184] ss:$8 sps:$4 sm:$0xff]   ;;  %v2335_v23 = vld [vmem:[%s3478_s2 + $0x1a0] ss:$8 sps:$4 sm:$0xff]  }
   0xa   :  { %1076 = vmatprep.subr.bf16.mxu0 %v2309_v5  ;;  %v2332_v21 = vld [vmem:[%s3478_s2 + $0x190] ss:$8 sps:$4 sm:$0xff]   ;;  %v2333_v22 = vld [vmem:[%s3478_s2 + $0x1a4] ss:$8 sps:$4 sm:$0xff]   ;;  %v2336_v24 = vld [vmem:[%s3478_s2 + $0x1b4] ss:$8 sps:$4 sm:$0xff]  }
   0xb   :  { %v2338_v25 = vld [vmem:[%s3478_s2 + $0x1b0] ss:$8 sps:$4 sm:$0xff]   ;;  %v2339_v26 = vld [vmem:[%s3478_s2 + $0x1c4] ss:$8 sps:$4 sm:$0xff]   ;;  %v2341_v27 = vld [vmem:[%s3478_s2 + $0x1c0] ss:$8 sps:$4 sm:$0xff]  }
   0xc   :  { %v2342_v28 = vld [vmem:[%s3478_s2 + $0x1d4] ss:$8 sps:$4 sm:$0xff]   ;;  %v2344_v29 = vld [vmem:[%s3478_s2 + $0x1d0] ss:$8 sps:$4 sm:$0xff]   ;;  %v2345_v30 = vld [vmem:[%s3478_s2 + $0x1e4] ss:$8 sps:$4 sm:$0xff]  }
   0xd   :  { %1077 = vmatpush1.bf16.msra.mxu0 %v2311_v6  ;;  %v2347_v31 = vld [vmem:[%s3478_s2 + $0x1e0] ss:$8 sps:$4 sm:$0xff]   ;;  %v2348_v32 = vld [vmem:[%s3478_s2 + $0x1f4] ss:$8 sps:$4 sm:$0xff]   ;;  %v2432_v33 = vld [vmem:[%s3478_s2 + $0x4] ss:$8 sps:$4 sm:$0xff]  }
   0xe   :  { %1078 = vmatprep.subr.bf16.mxu0 %v2312_v7  ;;  %v2434_v34 = vld [vmem:[%s3478_s2] ss:$8 sps:$4 sm:$0xff]   ;;  %v2350_v35 = vld [vmem:[%s3478_s2 + $0x1f0] ss:$8 sps:$4 sm:$0xff]   ;;  %v2356_v36 = vld [vmem:[%s3478_s2 + $0x204] ss:$8 sps:$4 sm:$0xff]   ;;  %1019 = vmatprep.subr.bf16.mxu1 %v2432_v33 }
   0xf   :  { %v2438_v37 = vld [vmem:[%s3478_s2 + $0x14] ss:$8 sps:$4 sm:$0xff]   ;;  %1020 = vmatpush1.bf16.msra.mxu1 %v2434_v34  ;;  %v2440_v38 = vld [vmem:[%s3478_s2 + $0x10] ss:$8 sps:$4 sm:$0xff]   ;;  %v2351_v39 = vld [vmem:[%s3477_s1 + $0x8] ss:$36 sps:$4 sm:$0xff]  }
  0x10   :  { %v2354_v40 = vld [vmem:[%s3478_s2 + $0x200] ss:$8 sps:$4 sm:$0xff]   ;;  %1021 = vmatprep.subr.bf16.mxu1 %v2438_v37  ;;  %v2396_v41 = vld [vmem:[%s3477_s1 + $0x54] ss:$36 sps:$4 sm:$0xff]   ;;  %v2444_v42 = vld [vmem:[%s3478_s2 + $0x24] ss:$8 sps:$4 sm:$0xff]  }
  0x11   :  { %1079 = vmatpush1.bf16.msra.mxu0 %v2314_v8  ;;  %v2359_v43 = vld [vmem:[%s3478_s2 + $0x214] ss:$8 sps:$4 sm:$0xff]   ;;  %v2446_v44 = vld [vmem:[%s3478_s2 + $0x20] ss:$8 sps:$4 sm:$0xff]   ;;  %v2357_v46 = vld [vmem:[%s3478_s2 + $0x210] ss:$8 sps:$4 sm:$0xff]  }
  0x12   :  { %1080 = vmatprep.subr.bf16.mxu0 %v2315_v9  ;;  %v2450_v45 = vld [vmem:[%s3478_s2 + $0x34] ss:$8 sps:$4 sm:$0xff]   ;;  %v2362_v47 = vld [vmem:[%s3478_s2 + $0x224] ss:$8 sps:$4 sm:$0xff]   ;;  %v2452_v48 = vld [vmem:[%s3478_s2 + $0x30] ss:$8 sps:$4 sm:$0xff]  }
  0x13   :  { %1022 = vmatpush1.bf16.msra.mxu1 %v2440_v38  ;;  %v2401_v49 = vld [vmem:[%s3477_s1 + $0x50] ss:$36 sps:$4 sm:$0xff]   ;;  %v2456_v50 = vld [vmem:[%s3478_s2 + $0x44] ss:$8 sps:$4 sm:$0xff]   ;;  %v2360_v51 = vld [vmem:[%s3478_s2 + $0x220] ss:$8 sps:$4 sm:$0xff]  }
  0x14   :  { %1023 = vmatprep.subr.bf16.mxu1 %v2444_v42  ;;  %v2407_v52 = vld [vmem:[%s3477_s1 + $0x14] ss:$36 sps:$4 sm:$0xff]   ;;  %v2458_v54 = vld [vmem:[%s3478_s2 + $0x40] ss:$8 sps:$4 sm:$0xff]   ;;  %v2368_v57 = vld [vmem:[%s3478_s2 + $0x244] ss:$8 sps:$4 sm:$0xff]  }
  0x15   :  { %1081 = vmatpush1.bf16.msra.mxu0 %v2317_v10  ;;  %v2365_v53 = vld [vmem:[%s3478_s2 + $0x234] ss:$8 sps:$4 sm:$0xff]   ;;  %v2363_v56 = vld [vmem:[%s3478_s2 + $0x230] ss:$8 sps:$4 sm:$0xff]   ;;  %v2468_v59 = vld [vmem:[%s3478_s2 + $0x64] ss:$8 sps:$4 sm:$0xff]  }
  0x16   :  { %1082 = vmatprep.subr.bf16.mxu0 %v2318_v11  ;;  %v2462_v55 = vld [vmem:[%s3478_s2 + $0x54] ss:$8 sps:$4 sm:$0xff]   ;;  %v2464_v58 = vld [vmem:[%s3478_s2 + $0x50] ss:$8 sps:$4 sm:$0xff]   ;;  %v2366_v60 = vld [vmem:[%s3478_s2 + $0x240] ss:$8 sps:$4 sm:$0xff]  }
  0x17   :  { %1024 = vmatpush1.bf16.msra.mxu1 %v2446_v44  ;;  %v2371_v61 = vld [vmem:[%s3478_s2 + $0x254] ss:$8 sps:$4 sm:$0xff]   ;;  %v2470_v62 = vld [vmem:[%s3478_s2 + $0x60] ss:$8 sps:$4 sm:$0xff]   ;;  %v2369_v0 = vld [vmem:[%s3478_s2 + $0x250] ss:$8 sps:$4 sm:$0xff]  }
  0x18   :  { %1025 = vmatprep.subr.bf16.mxu1 %v2450_v45  ;;  %v2476_v63 = vld [vmem:[%s3478_s2 + $0x74] ss:$8 sps:$4 sm:$0xff]   ;;  %v2374_v1 = vld [vmem:[%s3478_s2 + $0x264] ss:$8 sps:$4 sm:$0xff]   ;;  %v2479_v2 = vld [vmem:[%s3478_s2 + $0x70] ss:$8 sps:$4 sm:$0xff]  }
  0x19   :  { %1083 = vmatpush1.bf16.msra.mxu0 %v2320_v12  ;;  %v2483_v3 = vld [vmem:[%s3478_s2 + $0x84] ss:$8 sps:$4 sm:$0xff]   ;;  %v2372_v4 = vld [vmem:[%s3478_s2 + $0x260] ss:$8 sps:$4 sm:$0xff]   ;;  %v2377_v5 = vld [vmem:[%s3478_s2 + $0x274] ss:$8 sps:$4 sm:$0xff]  }
  0x1a   :  { %1084 = vmatprep.subr.bf16.mxu0 %v2321_v13  ;;  %v2485_v6 = vld [vmem:[%s3478_s2 + $0x80] ss:$8 sps:$4 sm:$0xff]   ;;  %v2492_v7 = vld [vmem:[%s3478_s2 + $0x94] ss:$8 sps:$4 sm:$0xff]   ;;  %v2375_v8 = vld [vmem:[%s3478_s2 + $0x270] ss:$8 sps:$4 sm:$0xff]  }
  0x1b   :  { %1026 = vmatpush1.bf16.msra.mxu1 %v2452_v48  ;;  %v2380_v9 = vld [vmem:[%s3478_s2 + $0x284] ss:$8 sps:$4 sm:$0xff]   ;;  %v2494_v10 = vld [vmem:[%s3478_s2 + $0x90] ss:$8 sps:$4 sm:$0xff]   ;;  %v2378_v12 = vld [vmem:[%s3478_s2 + $0x280] ss:$8 sps:$4 sm:$0xff]  }
  0x1c   :  { %1027 = vmatprep.subr.bf16.mxu1 %v2456_v50  ;;  %v2498_v11 = vld [vmem:[%s3478_s2 + $0xa4] ss:$8 sps:$4 sm:$0xff]   ;;  %v2383_v13 = vld [vmem:[%s3478_s2 + $0x294] ss:$8 sps:$4 sm:$0xff]   ;;  %v2500_v14 = vld [vmem:[%s3478_s2 + $0xa0] ss:$8 sps:$4 sm:$0xff]  }
  0x1d   :  { %1085 = vmatpush1.bf16.msra.mxu0 %v2323_v15  ;;  %v2504_v15 = vld [vmem:[%s3478_s2 + $0xb4] ss:$8 sps:$4 sm:$0xff]   ;;  %v2393_v33 = vld [vmem:[%s3478_s2 + $0x2d0] ss:$8 sps:$4 sm:$0xff]   ;;  %v2400_v34 = vld [vmem:[%s3478_s2 + $0x2e4] ss:$8 sps:$4 sm:$0xff]  }
  0x1e   :  { %1086 = vmatprep.subr.bf16.mxu0 %v2324_v16  ;;  %v2381_v16 = vld [vmem:[%s3478_s2 + $0x290] ss:$8 sps:$4 sm:$0xff]   ;;  %v2404_v37 = vld [vmem:[%s3478_s2 + $0x2f4] ss:$8 sps:$4 sm:$0xff]   ;;  %v2534_v38 = vld [vmem:[%s3477_s1] ss:$36 sps:$4 sm:$0xff]  }
  0x1f   :  { %1028 = vmatpush1.bf16.msra.mxu1 %v2458_v54  ;;  %v2405_v42 = vld [vmem:[%s3477_s1 + $0x10] ss:$36 sps:$4 sm:$0xff]   ;;  %v2471_v44 = vld [vmem:[%s3477_s1 + $0x5c] ss:$36 sps:$4 sm:$0xff]  }
  0x20   :  { %1029 = vmatprep.subr.bf16.mxu1 %v2462_v55  ;;  %v2413_v45 = vld [vmem:[%s3478_s2 + $0x314] ss:$8 sps:$4 sm:$0xff]  }
  0x21   :  { %1087 = vmatpush1.bf16.msra.mxu0 %v2326_v17  ;;  %v2386_v17 = vld [vmem:[%s3478_s2 + $0x2a4] ss:$8 sps:$4 sm:$0xff]  }
  0x22   :  { %1088 = vmatprep.subr.bf16.mxu0 %v2327_v18  ;;  %v2506_v18 = vld [vmem:[%s3478_s2 + $0xb0] ss:$8 sps:$4 sm:$0xff]  }
  0x23   :  { %1030 = vmatpush1.bf16.msra.mxu1 %v2464_v58 }
  0x24   :  { %1031 = vmatprep.subr.bf16.mxu1 %v2468_v59 }
  0x25   :  { %1089 = vmatpush1.bf16.msra.mxu0 %v2329_v19  ;;  %v2510_v19 = vld [vmem:[%s3478_s2 + $0xc4] ss:$8 sps:$4 sm:$0xff]  }
  0x26   :  { %1090 = vmatprep.subr.bf16.mxu0 %v2330_v20  ;;  %v2384_v20 = vld [vmem:[%s3478_s2 + $0x2a0] ss:$8 sps:$4 sm:$0xff]  }
  0x27   :  { %1032 = vmatpush1.bf16.msra.mxu1 %v2470_v62 }
  0x28   :  { %1033 = vmatprep.subr.bf16.mxu1 %v2476_v63 }
  0x29   :  { %1091 = vmatpush1.bf16.msra.mxu0 %v2332_v21  ;;  %v2536_v21 = vld [vmem:[%s3477_s1 + $0x4] ss:$36 sps:$4 sm:$0xff]  }
  0x2a   :  { %1092 = vmatprep.subr.bf16.mxu0 %v2333_v22  ;;  %v2389_v22 = vld [vmem:[%s3478_s2 + $0x2b4] ss:$8 sps:$4 sm:$0xff]   ;;  %1051 = vmatprep.mubr.bf16.mxu1 %v2536_v21 }
  0x2b   :  { %1034 = vmatpush1.bf16.msra.mxu1 %v2479_v2 }
  0x2c   :  { %1035 = vmatprep.subr.bf16.mxu1 %v2483_v3 }
  0x2d   :  { %1093 = vmatpush1.bf16.msra.mxu0 %v2335_v23  ;;  %v2387_v23 = vld [vmem:[%s3478_s2 + $0x2b0] ss:$8 sps:$4 sm:$0xff]  }
  0x2e   :  { %1094 = vmatprep.subr.bf16.mxu0 %v2336_v24  ;;  %v2512_v24 = vld [vmem:[%s3478_s2 + $0xc0] ss:$8 sps:$4 sm:$0xff]  }
  0x2f   :  { %1036 = vmatpush1.bf16.msra.mxu1 %v2485_v6 }
  0x30   :  { %1037 = vmatprep.subr.bf16.mxu1 %v2492_v7 }
  0x31   :  { %1095 = vmatpush1.bf16.msra.mxu0 %v2338_v25  ;;  %v2516_v25 = vld [vmem:[%s3478_s2 + $0xd4] ss:$8 sps:$4 sm:$0xff]  }
  0x32   :  { %1096 = vmatprep.subr.bf16.mxu0 %v2339_v26  ;;  %v2392_v26 = vld [vmem:[%s3478_s2 + $0x2c4] ss:$8 sps:$4 sm:$0xff]  }
  0x33   :  { %1038 = vmatpush1.bf16.msra.mxu1 %v2494_v10 }
  0x34   :  { %1039 = vmatprep.subr.bf16.mxu1 %v2498_v11 }
  0x35   :  { %1097 = vmatpush1.bf16.msra.mxu0 %v2341_v27  ;;  %v2518_v27 = vld [vmem:[%s3478_s2 + $0xd0] ss:$8 sps:$4 sm:$0xff]  }
  0x36   :  { %1098 = vmatprep.subr.bf16.mxu0 %v2342_v28  ;;  %v2522_v28 = vld [vmem:[%s3478_s2 + $0xe4] ss:$8 sps:$4 sm:$0xff]  }
  0x37   :  { %1040 = vmatpush1.bf16.msra.mxu1 %v2500_v14 }
  0x38   :  { %1041 = vmatprep.subr.bf16.mxu1 %v2504_v15 }
  0x39   :  { %1099 = vmatpush1.bf16.msra.mxu0 %v2344_v29  ;;  %v2390_v29 = vld [vmem:[%s3478_s2 + $0x2c0] ss:$8 sps:$4 sm:$0xff]  }
  0x3a   :  { %1100 = vmatprep.subr.bf16.mxu0 %v2345_v30  ;;  %v2395_v30 = vld [vmem:[%s3478_s2 + $0x2d4] ss:$8 sps:$4 sm:$0xff]  }
  0x3b   :  { %1042 = vmatpush1.bf16.msra.mxu1 %v2506_v18 }
  0x3c   :  { %1043 = vmatprep.subr.bf16.mxu1 %v2510_v19 }
  0x3d   :  { %1101 = vmatpush1.bf16.msra.mxu0 %v2347_v31  ;;  %v2524_v31 = vld [vmem:[%s3478_s2 + $0xe0] ss:$8 sps:$4 sm:$0xff]  }
  0x3e   :  { %1102 = vmatprep.subr.bf16.mxu0 %v2348_v32  ;;  %v2531_v32 = vld [vmem:[%s3478_s2 + $0xf4] ss:$8 sps:$4 sm:$0xff]  }
  0x3f   :  { %1044 = vmatpush1.bf16.msra.mxu1 %v2512_v24 }
  0x40   :  { %1045 = vmatprep.subr.bf16.mxu1 %v2516_v25 }
  0x41   :  { %1103 = vmatpush1.bf16.msra.mxu0 %v2350_v35  ;;  %v2533_v35 = vld [vmem:[%s3478_s2 + $0xf0] ss:$8 sps:$4 sm:$0xff]  }
  0x42   :  { %1125 = vmatprep.subr.bf16.mxu0 %v2356_v36  ;;  %v2398_v36 = vld [vmem:[%s3478_s2 + $0x2e0] ss:$8 sps:$4 sm:$0xff]  }
  0x43   :  { %1046 = vmatpush1.bf16.msra.mxu1 %v2518_v27 }
  0x44   :  { %1105 = vmatmul.mubr.bf16.vlgmr.msra.gmra.mrb[0].mxu0 %v2351_v39  ;;  %1047 = vmatprep.subr.bf16.mxu1 %v2522_v28  ;;  %v2541_v39 = vld [vmem:[%s3477_s1 + $0x4c] ss:$36 sps:$4 sm:$0xff]  }
  0x45   :  { %1126 = vmatpush1.bf16.msra.mxu0 %v2354_v40  ;;  %1114 = vmatprep.mubr.bf16.mxu0 %v2396_v41  ;;  %v2402_v40 = vld [vmem:[%s3478_s2 + $0x2f0] ss:$8 sps:$4 sm:$0xff]   ;;  %v2410_v41 = vld [vmem:[%s3478_s2 + $0x304] ss:$8 sps:$4 sm:$0xff]  }
  0x46   :  { %1127 = vmatprep.subr.bf16.mxu0 %v2359_v43  ;;  %v2408_v43 = vld [vmem:[%s3478_s2 + $0x300] ss:$8 sps:$4 sm:$0xff]  }
  0x47   :  { %1048 = vmatpush1.bf16.msra.mxu1 %v2524_v31 }
  0x48   :  { %1049 = vmatprep.subr.bf16.mxu1 %v2531_v32 }
  0x49   :  { %1128 = vmatpush1.bf16.msra.mxu0 %v2357_v46  ;;  %v2543_v46 = vld [vmem:[%s3477_s1 + $0x48] ss:$36 sps:$4 sm:$0xff]  }
  0x4a   :  { %1129 = vmatprep.subr.bf16.mxu0 %v2362_v47  ;;  %v2411_v47 = vld [vmem:[%s3478_s2 + $0x310] ss:$8 sps:$4 sm:$0xff]  }
  0x4b   :  { %1050 = vmatpush1.bf16.msra.mxu1 %v2533_v35 }
  0x4c   :  { %1115 = vmatmul.mubr.bf16.gmra.mrb[4].mxu0 %v2401_v49 }
  0x4d   :  { %1130 = vmatpush1.bf16.msra.mxu0 %v2360_v51  ;;  %1157 = vmatprep.mubr.bf16.mxu0 %v2407_v52 }
  0x4e   :  { %1131 = vmatprep.subr.bf16.mxu0 %v2365_v53  ;;  %1052 = vmatmul.mubr.bf16.vlgmr.msra.gmra.mrb[0].mxu1 %v2534_v38 }
  0x4f   :  { %1061 = vmatprep.mubr.bf16.mxu1 %v2541_v39 }
  0x51   :  { %1132 = vmatpush1.bf16.msra.mxu0 %v2363_v56 }
  0x52   :  { %1133 = vmatprep.subr.bf16.mxu0 %v2368_v57 }
  0x55   :  { %1134 = vmatpush1.bf16.msra.mxu0 %v2366_v60 }
  0x56   :  { %1135 = vmatprep.subr.bf16.mxu0 %v2371_v61 }
  0x59   :  { %1136 = vmatpush1.bf16.msra.mxu0 %v2369_v0 }
  0x5a   :  { %1137 = vmatprep.subr.bf16.mxu0 %v2374_v1 }
  0x5d   :  { %1138 = vmatpush1.bf16.msra.mxu0 %v2372_v4 }
  0x5e   :  { %1139 = vmatprep.subr.bf16.mxu0 %v2377_v5 }
  0x61   :  { %1140 = vmatpush1.bf16.msra.mxu0 %v2375_v8 }
  0x62   :  { %1141 = vmatprep.subr.bf16.mxu0 %v2380_v9 }
  0x65   :  { %1142 = vmatpush1.bf16.msra.mxu0 %v2378_v12 }
  0x66   :  { %1143 = vmatprep.subr.bf16.mxu0 %v2383_v13 }
  0x69   :  { %1144 = vmatpush1.bf16.msra.mxu0 %v2381_v16 }
  0x6a   :  { %1145 = vmatprep.subr.bf16.mxu0 %v2386_v17 }
  0x6d   :  { %1146 = vmatpush1.bf16.msra.mxu0 %v2384_v20 }
  0x6e   :  { %1147 = vmatprep.subr.bf16.mxu0 %v2389_v22 }
  0x71   :  { %1148 = vmatpush1.bf16.msra.mxu0 %v2387_v23 }
  0x72   :  { %1149 = vmatprep.subr.bf16.mxu0 %v2392_v26 }
  0x75   :  { %1150 = vmatpush1.bf16.msra.mxu0 %v2390_v29 }
  0x76   :  { %1151 = vmatprep.subr.bf16.mxu0 %v2395_v30 }
  0x79   :  { %1152 = vmatpush1.bf16.msra.mxu0 %v2393_v33 }
  0x7a   :  { %1153 = vmatprep.subr.bf16.mxu0 %v2400_v34 }
  0x7d   :  { %1154 = vmatpush1.bf16.msra.mxu0 %v2398_v36 }
  0x7e   :  { %1155 = vmatprep.subr.bf16.mxu0 %v2404_v37 }
  0x81   :  { %1156 = vmatpush1.bf16.msra.mxu0 %v2402_v40 }
  0x82   :  { %1178 = vmatprep.subr.bf16.mxu0 %v2410_v41 }
  0x84   :  { %1158 = vmatmul.mubr.bf16.vlgmr.msra.gmra.mrb[0].mxu0 %v2405_v42 }
  0x85   :  { %1179 = vmatpush1.bf16.msra.mxu0 %v2408_v43  ;;  %1167 = vmatprep.mubr.bf16.mxu0 %v2471_v44 }
  0x86   :  { %17 = vsyncpa [#allocation4], 0  ;;  %1180 = vmatprep.subr.bf16.mxu0 %v2413_v45  ;;  %v2416_v48 = vld [vmem:[%s3478_s2 + $0x324] ss:$8 sps:$4 sm:$0xff]   ;;  %1062 = vmatmul.mubr.bf16.gmra.mrb[4].mxu1 %v2543_v46  ;;  %v2671_v49 = vmov 0   ;;  %vm1310_vm0 = vcmask 261120  }
  0x87   :  { %1349 = vmatprep.mubr.bf16.mxu1 %v2671_v49  ;;  %v2478_v50 = vld [vmem:[%s3477_s1 + $0x58] ss:$36 sps:$4 sm:$0xff]   ;;  %v2414_v51 = vld [vmem:[%s3478_s2 + $0x320] ss:$8 sps:$4 sm:$0xff]   ;;  %v2422_v55 = vld [vmem:[%s3478_s2 + $0x344] ss:$8 sps:$4 sm:$0xff]  }
  0x88   :  { %v2488_v52 = vld [vmem:[%s3477_s1 + $0x1c] ss:$36 sps:$4 sm:$0xff]   ;;  %v2417_v54 = vld [vmem:[%s3478_s2 + $0x330] ss:$8 sps:$4 sm:$0xff]   ;;  %v2428_v59 = vld [vmem:[%s3478_s2 + $0x364] ss:$8 sps:$4 sm:$0xff]  }
  0x89   :  { %1181 = vmatpush1.bf16.msra.mxu0 %v2411_v47  ;;  %v2419_v53 = vld [vmem:[%s3478_s2 + $0x334] ss:$8 sps:$4 sm:$0xff]   ;;  %v2420_v56 = vld [vmem:[%s3478_s2 + $0x340] ss:$8 sps:$4 sm:$0xff]   ;;  %v2423_v58 = vld [vmem:[%s3478_s2 + $0x350] ss:$8 sps:$4 sm:$0xff]  }
  0x8a   :  { %1182 = vmatprep.subr.bf16.mxu0 %v2416_v48  ;;  %v2425_v57 = vld [vmem:[%s3478_s2 + $0x354] ss:$8 sps:$4 sm:$0xff]   ;;  %v2426_v60 = vld [vmem:[%s3478_s2 + $0x360] ss:$8 sps:$4 sm:$0xff]   ;;  %v2429_v62 = vld [vmem:[%s3478_s2 + $0x370] ss:$8 sps:$4 sm:$0xff]  }
  0x8b   :  { %v2431_v61 = vld [vmem:[%s3478_s2 + $0x374] ss:$8 sps:$4 sm:$0xff]   ;;  %v2437_v63 = vld [vmem:[%s3478_s2 + $0x384] ss:$8 sps:$4 sm:$0xff]   ;;  %v2435_v0 = vld [vmem:[%s3478_s2 + $0x380] ss:$8 sps:$4 sm:$0xff]  }
  0x8c   :  { %1168 = vmatmul.mubr.bf16.gmra.mrb[4].mxu0 %v2478_v50  ;;  %v2443_v1 = vld [vmem:[%s3478_s2 + $0x394] ss:$8 sps:$4 sm:$0xff]   ;;  %v2441_v2 = vld [vmem:[%s3478_s2 + $0x390] ss:$8 sps:$4 sm:$0xff]   ;;  %v2449_v3 = vld [vmem:[%s3478_s2 + $0x3a4] ss:$8 sps:$4 sm:$0xff]  }
  0x8d   :  { %1183 = vmatpush1.bf16.msra.mxu0 %v2414_v51  ;;  %1210 = vmatprep.mubr.bf16.mxu0 %v2488_v52  ;;  %v2447_v4 = vld [vmem:[%s3478_s2 + $0x3a0] ss:$8 sps:$4 sm:$0xff]   ;;  %v2455_v5 = vld [vmem:[%s3478_s2 + $0x3b4] ss:$8 sps:$4 sm:$0xff]   ;;  %v2453_v6 = vld [vmem:[%s3478_s2 + $0x3b0] ss:$8 sps:$4 sm:$0xff]  }
  0x8e   :  { %1184 = vmatprep.subr.bf16.mxu0 %v2419_v53  ;;  %v2461_v7 = vld [vmem:[%s3478_s2 + $0x3c4] ss:$8 sps:$4 sm:$0xff]   ;;  %v2459_v8 = vld [vmem:[%s3478_s2 + $0x3c0] ss:$8 sps:$4 sm:$0xff]   ;;  %v2467_v9 = vld [vmem:[%s3478_s2 + $0x3d4] ss:$8 sps:$4 sm:$0xff]  }
  0x8f   :  { %v2465_v10 = vld [vmem:[%s3478_s2 + $0x3d0] ss:$8 sps:$4 sm:$0xff]   ;;  %v2475_v11 = vld [vmem:[%s3478_s2 + $0x3e4] ss:$8 sps:$4 sm:$0xff]   ;;  %v2473_v12 = vld [vmem:[%s3478_s2 + $0x3e0] ss:$8 sps:$4 sm:$0xff]  }
  0x90   :  { %v2482_v13 = vld [vmem:[%s3478_s2 + $0x3f4] ss:$8 sps:$4 sm:$0xff]   ;;  %v2480_v14 = vld [vmem:[%s3478_s2 + $0x3f0] ss:$8 sps:$4 sm:$0xff]   ;;  %v2491_v15 = vld [vmem:[%s3478_s2 + $0x404] ss:$8 sps:$4 sm:$0xff]  }
  0x91   :  { %1185 = vmatpush1.bf16.msra.mxu0 %v2417_v54  ;;  %v2486_v16 = vld [vmem:[%s3477_s1 + $0x18] ss:$36 sps:$4 sm:$0xff]   ;;  %v2489_v17 = vld [vmem:[%s3478_s2 + $0x400] ss:$8 sps:$4 sm:$0xff]   ;;  %v2503_v21 = vld [vmem:[%s3478_s2 + $0x424] ss:$8 sps:$4 sm:$0xff]  }
  0x92   :  { %1186 = vmatprep.subr.bf16.mxu0 %v2422_v55  ;;  %v2525_v18 = vld [vmem:[%s3477_s1 + $0x64] ss:$36 sps:$4 sm:$0xff]   ;;  %v2497_v19 = vld [vmem:[%s3478_s2 + $0x414] ss:$8 sps:$4 sm:$0xff]   ;;  %v2495_v20 = vld [vmem:[%s3478_s2 + $0x410] ss:$8 sps:$4 sm:$0xff]  }
  0x93   :  { %v2527_v22 = vld [vmem:[%s3477_s1 + $0x60] ss:$36 sps:$4 sm:$0xff]   ;;  %v2509_v24 = vld [vmem:[%s3478_s2 + $0x434] ss:$8 sps:$4 sm:$0xff]   ;;  %v2507_v25 = vld [vmem:[%s3478_s2 + $0x430] ss:$8 sps:$4 sm:$0xff]  }
  0x94   :  { %v2501_v23 = vld [vmem:[%s3478_s2 + $0x420] ss:$8 sps:$4 sm:$0xff]   ;;  %v2515_v26 = vld [vmem:[%s3478_s2 + $0x444] ss:$8 sps:$4 sm:$0xff]   ;;  %v2521_v28 = vld [vmem:[%s3478_s2 + $0x454] ss:$8 sps:$4 sm:$0xff]  }
  0x95   :  { %1187 = vmatpush1.bf16.msra.mxu0 %v2420_v56  ;;  %v2513_v27 = vld [vmem:[%s3478_s2 + $0x440] ss:$8 sps:$4 sm:$0xff]   ;;  %v2519_v29 = vld [vmem:[%s3478_s2 + $0x450] ss:$8 sps:$4 sm:$0xff]   ;;  %v2530_v30 = vld [vmem:[%s3478_s2 + $0x464] ss:$8 sps:$4 sm:$0xff]  }
  0x96   :  { %1188 = vmatprep.subr.bf16.mxu0 %v2425_v57  ;;  %v2528_v31 = vld [vmem:[%s3478_s2 + $0x460] ss:$8 sps:$4 sm:$0xff]   ;;  %v2539_v32 = vld [vmem:[%s3478_s2 + $0x474] ss:$8 sps:$4 sm:$0xff]   ;;  %v2537_v33 = vld [vmem:[%s3478_s2 + $0x470] ss:$8 sps:$4 sm:$0xff]  }
  0x97   :  { %v2540_v34 = vld [vmem:[%s3477_s1 + $0x20] ss:$36 sps:$4 sm:$0xff]   ;;  %v2544_v35 = vld [vmem:[%s3477_s1 + $0x68] ss:$36 sps:$4 sm:$0xff]   ;;  %s2672_s18 = smov [#allocation3]   ;;  %vm2018_vm1 = vcmask 0  }
  0x98   :  { %s2026_s19 = sshll.u32 %s2672_s18, 4  ;;  %s2027_s19 = int_to_ptr.vmem [resolvable:$true] %s2026_s19 }
  0x99   :  { %1189 = vmatpush1.bf16.msra.mxu0 %v2423_v58  ;;  %s2647_s20 = scalar_lea.vmem %s2027_s19, 16  ;;  %p2652_p1 = scmp.lt.s32.totalorder %s2027_s19, %s2027_s19 }
  0x9a   :  { %1190 = vmatprep.subr.bf16.mxu0 %v2428_v59  ;;  %p2648_p0 = scmp.ne.s32.totalorder %s2027_s19, %s2647_s20 }
  0x9d   :  { %1191 = vmatpush1.bf16.msra.mxu0 %v2426_v60 }
  0x9e   :  { %1192 = vmatprep.subr.bf16.mxu0 %v2431_v61 }
  0xa1   :  { %1193 = vmatpush1.bf16.msra.mxu0 %v2429_v62 }
  0xa2   :  { %1194 = vmatprep.subr.bf16.mxu0 %v2437_v63 }
  0xa5   :  { %1195 = vmatpush1.bf16.msra.mxu0 %v2435_v0 }
  0xa6   :  { %1196 = vmatprep.subr.bf16.mxu0 %v2443_v1  ;;  %v2549_v1 = vld [vmem:[%s3480_s4 + $0x4] ss:$8 sps:$4 sm:$0xff]  }
  0xa9   :  { %1197 = vmatpush1.bf16.msra.mxu0 %v2441_v2  ;;  %v3226_v2 = vld [vmem:[%s3476_s0] sm:$0xff]  }
  0xaa   :  { %1198 = vmatprep.subr.bf16.mxu0 %v2449_v3  ;;  %v2547_v3 = vld [vmem:[%s3480_s4] ss:$8 sps:$4 sm:$0xff]  }
  0xad   :  { %1199 = vmatpush1.bf16.msra.mxu0 %v2447_v4  ;;  %v2552_v4 = vld [vmem:[%s3480_s4 + $0x14] ss:$8 sps:$4 sm:$0xff]  }
  0xae   :  { %1200 = vmatprep.subr.bf16.mxu0 %v2455_v5  ;;  %v2550_v5 = vld [vmem:[%s3480_s4 + $0x10] ss:$8 sps:$4 sm:$0xff]  }
  0xb1   :  { %1201 = vmatpush1.bf16.msra.mxu0 %v2453_v6  ;;  %v2555_v6 = vld [vmem:[%s3480_s4 + $0x24] ss:$8 sps:$4 sm:$0xff]  }
  0xb2   :  { %1202 = vmatprep.subr.bf16.mxu0 %v2461_v7  ;;  %v3246_v7 = vld [vmem:[%s3476_s0 + $0x8] sm:$0xff]   ;;  %s2651_s0 = scalar_lea.vmem %s2027_s19, 32 }
  0xb3   :  { %p2653_p2 = scmp.lt.s32.totalorder %s2651_s0, %s2647_s20 }
  0xb5   :  { %1203 = vmatpush1.bf16.msra.mxu0 %v2459_v8  ;;  %v2553_v8 = vld [vmem:[%s3480_s4 + $0x20] ss:$8 sps:$4 sm:$0xff]   ;;  %p2654_p3 = por %p2653_p2, %p2652_p1 }
  0xb6   :  { %1204 = vmatprep.subr.bf16.mxu0 %v2467_v9  ;;  %v2558_v9 = vld [vmem:[%s3480_s4 + $0x34] ss:$8 sps:$4 sm:$0xff]  }
  0xb7   :  { %p2655_p4 = pnand %p2654_p3, %p2648_p0 }
  0xb9   :  { %1205 = vmatpush1.bf16.msra.mxu0 %v2465_v10  ;;  %v2556_v10 = vld [vmem:[%s3480_s4 + $0x30] ss:$8 sps:$4 sm:$0xff]  }
  0xba   :  { %1206 = vmatprep.subr.bf16.mxu0 %v2475_v11  ;;  %v2561_v11 = vld [vmem:[%s3480_s4 + $0x44] ss:$8 sps:$4 sm:$0xff]  }
  0xbd   :  { %1207 = vmatpush1.bf16.msra.mxu0 %v2473_v12  ;;  %v2559_v12 = vld [vmem:[%s3480_s4 + $0x40] ss:$8 sps:$4 sm:$0xff]  }
  0xbe   :  { %1208 = vmatprep.subr.bf16.mxu0 %v2482_v13  ;;  %v2564_v13 = vld [vmem:[%s3480_s4 + $0x54] ss:$8 sps:$4 sm:$0xff]  }
  0xc1   :  { %1209 = vmatpush1.bf16.msra.mxu0 %v2480_v14  ;;  %v2562_v14 = vld [vmem:[%s3480_s4 + $0x50] ss:$8 sps:$4 sm:$0xff]  }
  0xc2   :  { %1231 = vmatprep.subr.bf16.mxu0 %v2491_v15  ;;  %v2567_v15 = vld [vmem:[%s3480_s4 + $0x64] ss:$8 sps:$4 sm:$0xff]  }
  0xc4   :  { %1211 = vmatmul.mubr.bf16.vlgmr.msra.gmra.mrb[0].mxu0 %v2486_v16  ;;  %v2565_v16 = vld [vmem:[%s3480_s4 + $0x60] ss:$8 sps:$4 sm:$0xff]  }
  0xc5   :  { %1232 = vmatpush1.bf16.msra.mxu0 %v2489_v17  ;;  %1220 = vmatprep.mubr.bf16.mxu0 %v2525_v18  ;;  %v2570_v17 = vld [vmem:[%s3480_s4 + $0x74] ss:$8 sps:$4 sm:$0xff]   ;;  %v2568_v18 = vld [vmem:[%s3480_s4 + $0x70] ss:$8 sps:$4 sm:$0xff]  }
  0xc6   :  { %1233 = vmatprep.subr.bf16.mxu0 %v2497_v19  ;;  %v2573_v19 = vld [vmem:[%s3480_s4 + $0x84] ss:$8 sps:$4 sm:$0xff]  }
  0xc9   :  { %1234 = vmatpush1.bf16.msra.mxu0 %v2495_v20  ;;  %v2571_v20 = vld [vmem:[%s3480_s4 + $0x80] ss:$8 sps:$4 sm:$0xff]  }
  0xca   :  { %1235 = vmatprep.subr.bf16.mxu0 %v2503_v21  ;;  %v2576_v21 = vld [vmem:[%s3480_s4 + $0x94] ss:$8 sps:$4 sm:$0xff]  }
  0xcc   :  { %1221 = vmatmul.mubr.bf16.gmra.mrb[4].mxu0 %v2527_v22  ;;  %v2574_v22 = vld [vmem:[%s3480_s4 + $0x90] ss:$8 sps:$4 sm:$0xff]  }
  0xcd   :  { %1236 = vmatpush1.bf16.msra.mxu0 %v2501_v23  ;;  %1263 = vmatprep.mubr.bf16.mxu0 %v2671_v49  ;;  %v2579_v23 = vld [vmem:[%s3480_s4 + $0xa4] ss:$8 sps:$4 sm:$0xff]  }
  0xce   :  { %1237 = vmatprep.subr.bf16.mxu0 %v2509_v24  ;;  %v2577_v24 = vld [vmem:[%s3480_s4 + $0xa0] ss:$8 sps:$4 sm:$0xff]  }
  0xd1   :  { %1238 = vmatpush1.bf16.msra.mxu0 %v2507_v25  ;;  %v2582_v25 = vld [vmem:[%s3480_s4 + $0xb4] ss:$8 sps:$4 sm:$0xff]  }
  0xd2   :  { %1239 = vmatprep.subr.bf16.mxu0 %v2515_v26  ;;  %v2580_v26 = vld [vmem:[%s3480_s4 + $0xb0] ss:$8 sps:$4 sm:$0xff]  }
  0xd5   :  { %1240 = vmatpush1.bf16.msra.mxu0 %v2513_v27  ;;  %v2585_v27 = vld [vmem:[%s3480_s4 + $0xc4] ss:$8 sps:$4 sm:$0xff]  }
  0xd6   :  { %1241 = vmatprep.subr.bf16.mxu0 %v2521_v28  ;;  %v2583_v28 = vld [vmem:[%s3480_s4 + $0xc0] ss:$8 sps:$4 sm:$0xff]  }
  0xd9   :  { %1242 = vmatpush1.bf16.msra.mxu0 %v2519_v29  ;;  %v2588_v29 = vld [vmem:[%s3480_s4 + $0xd4] ss:$8 sps:$4 sm:$0xff]  }
  0xda   :  { %1243 = vmatprep.subr.bf16.mxu0 %v2530_v30  ;;  %v2586_v30 = vld [vmem:[%s3480_s4 + $0xd0] ss:$8 sps:$4 sm:$0xff]  }
  0xdd   :  { %1244 = vmatpush1.bf16.msra.mxu0 %v2528_v31  ;;  %v2591_v31 = vld [vmem:[%s3480_s4 + $0xe4] ss:$8 sps:$4 sm:$0xff]  }
  0xde   :  { %1245 = vmatprep.subr.bf16.mxu0 %v2539_v32  ;;  %v2589_v32 = vld [vmem:[%s3480_s4 + $0xe0] ss:$8 sps:$4 sm:$0xff]  }
  0xe1   :  { %1246 = vmatpush1.bf16.msra.mxu0 %v2537_v33  ;;  %v2594_v33 = vld [vmem:[%s3480_s4 + $0xf4] ss:$8 sps:$4 sm:$0xff]  }
  0xe4   :  { %1264 = vmatmul.mubr.bf16.vlgmr.msra.gmra.mrb[0].mxu0 %v2540_v34  ;;  %v2592_v34 = vld [vmem:[%s3480_s4 + $0xf0] ss:$8 sps:$4 sm:$0xff]  }
  0xe5   :  { %1273 = vmatprep.mubr.bf16.mxu0 %v2671_v49 }
  0xec   :  { %1274 = vmatmul.mubr.bf16.gmra.mrb[4].mxu0 %v2544_v35  ;;  %v2597_v35 = vld [vmem:[%s3482_s6 + $0x4] ss:$8 sps:$4 sm:$0xff]  }
 0x121   :  { %v1053_v36 = vpop.f32.mrb[0].mxu1 }
 0x122   :  { %v1055_v37 = vpop.f32.mrb[1].mxu1 }
 0x123   :  { %v1057_v38 = vpop.f32.mrb[2].mxu1 }
 0x124   :  { %v1059_v39 = vpop.f32.mrb[3].mxu1 }
 0x159   :  { %v1063_v40 = vpop.f32.mrb[4].mxu1 }
 0x15a   :  { %v1065_v41 = vpop.f32.mrb[5].mxu1 }
 0x15b   :  { %v1067_v42 = vpop.f32.mrb[6].mxu1 }
 0x15c   :  { %v1069_v43 = vpop.f32.mrb[7].mxu1 }
 0x1b7   :  { %v1265_v44 = vpop.f32.mrb[0].mxu0 }
 0x1b8   :  { %v2267_v45 = vadd.f32 %v1265_v44, %v1053_v36  ;;  %v1267_v46 = vpop.f32.mrb[1].mxu0  ;;  %v1290_v36 = vlaneseq }
 0x1b9   :  { %v2268_v47 = vadd.f32 %v1267_v46, %v1055_v37  ;;  %v1269_v48 = vpop.f32.mrb[2].mxu0 }
 0x1ba   :  { %v2269_v50 = vadd.f32 %v1269_v48, %v1057_v38  ;;  %v1271_v51 = vpop.f32.mrb[3].mxu0  ;;  %v1291_v37 = vshrl.u32 %v1290_v36, 7  ;;  %v2634_v36 = vld [vmem:[%s3482_s6 + $0xd0] ss:$8 sps:$4 sm:$0xff]  }
 0x1bb   :  { %v2270_v52 = vadd.f32 %v1271_v51, %v1059_v39  ;;  %v1288_v39 = vld [vmem:[%s3479_s3] sm:$0x3] }
 0x1bc   :  { %v1284_v53 = vpack.c.bf16 %v2269_v50, %v2267_v45  ;;  %v3334_v38 = vsub.s32 0, %v1291_v37 }
 0x1bd   :  { %v1285_v54 = vpack.c.bf16 %v2270_v52, %v2268_v47 }
 0x1bf   :  { %v1275_v55 = vpop.f32.mrb[4].mxu0  ;;  %1317 = vmatprep.subr.bf16.mxu1 %v1285_v54 }
 0x1c0   :  { %v2271_v56 = vadd.f32 %v1275_v55, %v1063_v40  ;;  %v1277_v57 = vpop.f32.mrb[5].mxu0  ;;  %1318 = vmatpush1.bf16.msra.mxu1 %v1284_v53  ;;  %v3339_v40 = vsub.s32 1, %v1291_v37  ;;  %v2639_v37 = vld [vmem:[%s3482_s6 + $0xe4] ss:$8 sps:$4 sm:$0xff]  }
 0x1c1   :  { %v2272_v58 = vadd.f32 %v1277_v57, %v1065_v41  ;;  %v1279_v59 = vpop.f32.mrb[6].mxu0  ;;  %v1293_v41 = vrot.slane %v1288_v39, %v3334_v38 }
 0x1c2   :  { %v2273_v60 = vadd.f32 %v1279_v59, %v1067_v42  ;;  %v1281_v61 = vpop.f32.mrb[7].mxu0  ;;  %v1297_v42 = vrot.slane %v1288_v39, %v3339_v40  ;;  %v2595_v59 = vld [vmem:[%s3482_s6] ss:$8 sps:$4 sm:$0xff]  }
 0x1c3   :  { %v2274_v62 = vadd.f32 %v1281_v61, %v1069_v43  ;;  %v2637_v39 = vld [vmem:[%s3482_s6 + $0xe0] ss:$8 sps:$4 sm:$0xff]  }
 0x1c4   :  { %v1286_v63 = vpack.c.bf16 %v2273_v60, %v2271_v56 }
 0x1c5   :  { %v1287_v0 = vpack.c.bf16 %v2274_v62, %v2272_v58  ;;  %v2600_v62 = vld [vmem:[%s3482_s6 + $0x14] ss:$8 sps:$4 sm:$0xff]  }
 0x1c7   :  { %1319 = vmatprep.subr.bf16.mxu1 %v1287_v0 }
 0x1c8   :  { %1320 = vmatpush1.bf16.msra.mxu1 %v1286_v63 }
 0x1c9   :  { %1586 = vmatprep.subr.bf16.mxu1 %v2549_v1 }
 0x1cb   :  { %2198 = vmatmul.mubr.msk.bf16.vlgmr.msra.gmra.mrb[8].mxu1 %vm1310_vm0, %v3226_v2 }
 0x1cc   :  { %1359 = vmatprep.mubr.bf16.mxu1 %v2671_v49  ;;  %1587 = vmatpush1.bf16.msra.mxu1 %v2547_v3 }
 0x1cd   :  { %1588 = vmatprep.subr.bf16.mxu1 %v2552_v4 }
 0x1d0   :  { %1589 = vmatpush1.bf16.msra.mxu1 %v2550_v5  ;;  %v2598_v5 = vld [vmem:[%s3482_s6 + $0x10] ss:$8 sps:$4 sm:$0xff]  }
 0x1d1   :  { %1590 = vmatprep.subr.bf16.mxu1 %v2555_v6 }
 0x1d3   :  { %2199 = vmatmul.mubr.msk.bf16.gmra.mrb[12].mxu1 %vm1310_vm0, %v3246_v7 }
 0x1d4   :  { %1591 = vmatpush1.bf16.msra.mxu1 %v2553_v8 }
 0x1d5   :  { %1592 = vmatprep.subr.bf16.mxu1 %v2558_v9  ;;  %v2603_v9 = vld [vmem:[%s3482_s6 + $0x24] ss:$8 sps:$4 sm:$0xff]  }
 0x1d8   :  { %1593 = vmatpush1.bf16.msra.mxu1 %v2556_v10 }
 0x1d9   :  { %1594 = vmatprep.subr.bf16.mxu1 %v2561_v11 }
 0x1dc   :  { %1595 = vmatpush1.bf16.msra.mxu1 %v2559_v12 }
 0x1dd   :  { %1596 = vmatprep.subr.bf16.mxu1 %v2564_v13 }
 0x1e0   :  { %1597 = vmatpush1.bf16.msra.mxu1 %v2562_v14  ;;  %v2601_v14 = vld [vmem:[%s3482_s6 + $0x20] ss:$8 sps:$4 sm:$0xff]  }
 0x1e1   :  { %1598 = vmatprep.subr.bf16.mxu1 %v2567_v15  ;;  %v2606_v15 = vld [vmem:[%s3482_s6 + $0x34] ss:$8 sps:$4 sm:$0xff]  }
 0x1e4   :  { %1599 = vmatpush1.bf16.msra.mxu1 %v2565_v16  ;;  %v2604_v16 = vld [vmem:[%s3482_s6 + $0x30] ss:$8 sps:$4 sm:$0xff]  }
 0x1e5   :  { %1600 = vmatprep.subr.bf16.mxu1 %v2570_v17  ;;  %v2609_v17 = vld [vmem:[%s3482_s6 + $0x44] ss:$8 sps:$4 sm:$0xff]  }
 0x1e8   :  { %1601 = vmatpush1.bf16.msra.mxu1 %v2568_v18  ;;  %v2607_v18 = vld [vmem:[%s3482_s6 + $0x40] ss:$8 sps:$4 sm:$0xff]  }
 0x1e9   :  { %1602 = vmatprep.subr.bf16.mxu1 %v2573_v19  ;;  %v2612_v19 = vld [vmem:[%s3482_s6 + $0x54] ss:$8 sps:$4 sm:$0xff]  }
 0x1ec   :  { %1603 = vmatpush1.bf16.msra.mxu1 %v2571_v20  ;;  %v2610_v20 = vld [vmem:[%s3482_s6 + $0x50] ss:$8 sps:$4 sm:$0xff]  }
 0x1ed   :  { %1604 = vmatprep.subr.bf16.mxu1 %v2576_v21  ;;  %v2615_v21 = vld [vmem:[%s3482_s6 + $0x64] ss:$8 sps:$4 sm:$0xff]  }
 0x1f0   :  { %1605 = vmatpush1.bf16.msra.mxu1 %v2574_v22  ;;  %v2613_v22 = vld [vmem:[%s3482_s6 + $0x60] ss:$8 sps:$4 sm:$0xff]  }
 0x1f1   :  { %1606 = vmatprep.subr.bf16.mxu1 %v2579_v23  ;;  %v2618_v23 = vld [vmem:[%s3482_s6 + $0x74] ss:$8 sps:$4 sm:$0xff]  }
 0x1f4   :  { %1607 = vmatpush1.bf16.msra.mxu1 %v2577_v24  ;;  %v2616_v24 = vld [vmem:[%s3482_s6 + $0x70] ss:$8 sps:$4 sm:$0xff]  }
 0x1f5   :  { %1608 = vmatprep.subr.bf16.mxu1 %v2582_v25  ;;  %v2621_v25 = vld [vmem:[%s3482_s6 + $0x84] ss:$8 sps:$4 sm:$0xff]  }
 0x1f8   :  { %1609 = vmatpush1.bf16.msra.mxu1 %v2580_v26  ;;  %v2619_v26 = vld [vmem:[%s3482_s6 + $0x80] ss:$8 sps:$4 sm:$0xff]  }
 0x1f9   :  { %1610 = vmatprep.subr.bf16.mxu1 %v2585_v27  ;;  %v2624_v27 = vld [vmem:[%s3482_s6 + $0x94] ss:$8 sps:$4 sm:$0xff]  }
 0x1fc   :  { %1611 = vmatpush1.bf16.msra.mxu1 %v2583_v28  ;;  %v2622_v28 = vld [vmem:[%s3482_s6 + $0x90] ss:$8 sps:$4 sm:$0xff]  }
 0x1fd   :  { %1612 = vmatprep.subr.bf16.mxu1 %v2588_v29  ;;  %v2627_v29 = vld [vmem:[%s3482_s6 + $0xa4] ss:$8 sps:$4 sm:$0xff]  }
 0x200   :  { %1613 = vmatpush1.bf16.msra.mxu1 %v2586_v30  ;;  %v2625_v30 = vld [vmem:[%s3482_s6 + $0xa0] ss:$8 sps:$4 sm:$0xff]  }
 0x201   :  { %1614 = vmatprep.subr.bf16.mxu1 %v2591_v31  ;;  %v2630_v31 = vld [vmem:[%s3482_s6 + $0xb4] ss:$8 sps:$4 sm:$0xff]  }
 0x204   :  { %1615 = vmatpush1.bf16.msra.mxu1 %v2589_v32  ;;  %v2628_v32 = vld [vmem:[%s3482_s6 + $0xb0] ss:$8 sps:$4 sm:$0xff]  }
 0x205   :  { %1616 = vmatprep.subr.bf16.mxu1 %v2594_v33  ;;  %v2633_v33 = vld [vmem:[%s3482_s6 + $0xc4] ss:$8 sps:$4 sm:$0xff]  }
 0x208   :  { %1617 = vmatpush1.bf16.msra.mxu1 %v2592_v34  ;;  %v2631_v34 = vld [vmem:[%s3482_s6 + $0xc0] ss:$8 sps:$4 sm:$0xff]  }
 0x209   :  { %1843 = vmatprep.subr.bf16.mxu1 %v2597_v35  ;;  %v2636_v35 = vld [vmem:[%s3482_s6 + $0xd4] ss:$8 sps:$4 sm:$0xff]  }
 0x29e   :  { %v1351_v43 = vpop.f32.mrb[8].mxu1 }
 0x29f   :  { %v1352_v44 = vadd.f32 %v1351_v43, %v1293_v41  ;;  %v1353_v45 = vpop.f32.mrb[9].mxu1  ;;  %v1414_v43 = vld [vmem:[%s3481_s5] sm:$0x3] }
 0x2a0   :  { %v1354_v46 = vadd.f32 %v1353_v45, %v1297_v42  ;;  %v1355_v47 = vpop.f32.mrb[10].mxu1  ;;  %v1423_v45 = vrot.slane %v1414_v43, %v3339_v40 }
 0x2a1   :  { %v1356_v48 = vadd.f32 %v1355_v47, %v1293_v41  ;;  %v1357_v50 = vpop.f32.mrb[11].mxu1  ;;  %v1370_v52 = vmax.f32 %v1352_v44, 0.0  ;;  %v1419_v44 = vrot.slane %v1414_v43, %v3334_v38 }
 0x2a2   :  { %v1358_v51 = vadd.f32 %v1357_v50, %v1297_v42  ;;  %v1371_v54 = vmax.f32 %v1354_v46, 0.0 }
 0x2a3   :  { %v1372_v53 = vmax.f32 %v1356_v48, 0.0 }
 0x2a4   :  { %v1373_v55 = vmax.f32 %v1358_v51, 0.0 }
 0x2a5   :  { %v1378_v56 = vpack.c.bf16 %v1372_v53, %v1370_v52 }
 0x2a6   :  { %v1379_v57 = vpack.c.bf16 %v1373_v55, %v1371_v54  ;;  %v1361_v58 = vpop.f32.mrb[12].mxu1 }
 0x2a7   :  { %v1362_v60 = vadd.f32 %v1361_v58, %v1293_v41  ;;  %v1363_v61 = vpop.f32.mrb[13].mxu1 }
 0x2a8   :  { %v1364_v63 = vadd.f32 %v1363_v61, %v1297_v42  ;;  %v1365_v0 = vpop.f32.mrb[14].mxu1  ;;  %1618 = vmatprep.mubr.bf16.mxu1 %v1379_v57 }
 0x2a9   :  { %v1366_v1 = vadd.f32 %v1365_v0, %v1293_v41  ;;  %v1367_v3 = vpop.f32.mrb[15].mxu1  ;;  %1619 = vmatmul.mubr.bf16.vlgmr.msra.gmra.mrb[16].mxu1 %v1378_v56  ;;  %v1374_v6 = vmax.f32 %v1362_v60, 0.0  ;;  %v2642_v41 = vld [vmem:[%s3482_s6 + $0xf4] ss:$8 sps:$4 sm:$0xff]  }
 0x2aa   :  { %v1368_v4 = vadd.f32 %v1367_v3, %v1297_v42  ;;  %1844 = vmatpush1.bf16.msra.mxu1 %v2595_v59  ;;  %v1375_v10 = vmax.f32 %v1364_v63, 0.0  ;;  %v2640_v42 = vld [vmem:[%s3482_s6 + $0xf0] ss:$8 sps:$4 sm:$0xff]  }
 0x2ab   :  { %v1376_v8 = vmax.f32 %v1366_v1, 0.0  ;;  %1845 = vmatprep.subr.bf16.mxu1 %v2600_v62 }
 0x2ac   :  { %v1377_v11 = vmax.f32 %v1368_v4, 0.0 }
 0x2ad   :  { %v1380_v12 = vpack.c.bf16 %v1376_v8, %v1374_v6 }
 0x2ae   :  { %v1381_v13 = vpack.c.bf16 %v1377_v11, %v1375_v10  ;;  %1846 = vmatpush1.bf16.msra.mxu1 %v2598_v5 }
 0x2af   :  { %1847 = vmatprep.subr.bf16.mxu1 %v2603_v9 }
 0x2b0   :  { %1628 = vmatprep.mubr.bf16.mxu1 %v1381_v13 }
 0x2b1   :  { %1629 = vmatmul.mubr.bf16.gmra.mrb[20].mxu1 %v1380_v12 }
 0x2b2   :  { %1848 = vmatpush1.bf16.msra.mxu1 %v2601_v14 }
 0x2b3   :  { %1849 = vmatprep.subr.bf16.mxu1 %v2606_v15 }
 0x2b6   :  { %1850 = vmatpush1.bf16.msra.mxu1 %v2604_v16 }
 0x2b7   :  { %1851 = vmatprep.subr.bf16.mxu1 %v2609_v17 }
 0x2ba   :  { %1852 = vmatpush1.bf16.msra.mxu1 %v2607_v18 }
 0x2bb   :  { %1853 = vmatprep.subr.bf16.mxu1 %v2612_v19 }
 0x2be   :  { %1854 = vmatpush1.bf16.msra.mxu1 %v2610_v20 }
 0x2bf   :  { %1855 = vmatprep.subr.bf16.mxu1 %v2615_v21 }
 0x2c2   :  { %1856 = vmatpush1.bf16.msra.mxu1 %v2613_v22 }
 0x2c3   :  { %1857 = vmatprep.subr.bf16.mxu1 %v2618_v23 }
 0x2c6   :  { %1858 = vmatpush1.bf16.msra.mxu1 %v2616_v24 }
 0x2c7   :  { %1859 = vmatprep.subr.bf16.mxu1 %v2621_v25  ;;  %v1900_v25 = vld [vmem:[%s3483_s7] sm:$0x3] }
 0x2ca   :  { %1860 = vmatpush1.bf16.msra.mxu1 %v2619_v26  ;;  %v1905_v26 = vrot.slane %v1900_v25, %v3334_v38 }
 0x2cb   :  { %1861 = vmatprep.subr.bf16.mxu1 %v2624_v27  ;;  %v1973_v27 = vld [vmem:[%s3484_s8] sm:$0xff] }
 0x2ce   :  { %1862 = vmatpush1.bf16.msra.mxu1 %v2622_v28  ;;  %v1909_v28 = vrot.slane %v1900_v25, %v3339_v40 }
 0x2cf   :  { %1863 = vmatprep.subr.bf16.mxu1 %v2627_v29 }
 0x2d2   :  { %1864 = vmatpush1.bf16.msra.mxu1 %v2625_v30  ;;  %v1977_v30 = vunpack.c.l.bf16 %v1973_v27 }
 0x2d3   :  { %1865 = vmatprep.subr.bf16.mxu1 %v2630_v31 }
 0x2d6   :  { %1866 = vmatpush1.bf16.msra.mxu1 %v2628_v32  ;;  %v1978_v32 = vunpack.c.h.bf16 %v1973_v27 }
 0x2d7   :  { %1867 = vmatprep.subr.bf16.mxu1 %v2633_v33 }
 0x2da   :  { %1868 = vmatpush1.bf16.msra.mxu1 %v2631_v34 }
 0x2db   :  { %1869 = vmatprep.subr.bf16.mxu1 %v2636_v35 }
 0x2de   :  { %1870 = vmatpush1.bf16.msra.mxu1 %v2634_v36 }
 0x2df   :  { %1871 = vmatprep.subr.bf16.mxu1 %v2639_v37 }
 0x2e2   :  { %1872 = vmatpush1.bf16.msra.mxu1 %v2637_v39 }
 0x2e3   :  { %1873 = vmatprep.subr.bf16.mxu1 %v2642_v41 }
 0x2e6   :  { %1874 = vmatpush1.bf16.msra.mxu1 %v2640_v42 }
 0x37c   :  { %v1620_v46 = vpop.f32.mrb[16].mxu1 }
 0x37d   :  { %v1621_v47 = vadd.f32 %v1620_v46, %v1419_v44  ;;  %v1622_v48 = vpop.f32.mrb[17].mxu1 }
 0x37e   :  { %v1623_v50 = vadd.f32 %v1622_v48, %v1423_v45  ;;  %v1624_v51 = vpop.f32.mrb[18].mxu1 }
 0x37f   :  { %v1625_v52 = vadd.f32 %v1624_v51, %v1419_v44  ;;  %v1626_v53 = vpop.f32.mrb[19].mxu1  ;;  %v1639_v55 = vmax.f32 %v1621_v47, 0.0 }
 0x380   :  { %v1627_v54 = vadd.f32 %v1626_v53, %v1423_v45  ;;  %v1640_v57 = vmax.f32 %v1623_v50, 0.0 }
 0x381   :  { %v1641_v56 = vmax.f32 %v1625_v52, 0.0 }
 0x382   :  { %v1642_v58 = vmax.f32 %v1627_v54, 0.0 }
 0x383   :  { %v1647_v59 = vpack.c.bf16 %v1641_v56, %v1639_v55 }
 0x384   :  { %v1648_v60 = vpack.c.bf16 %v1642_v58, %v1640_v57  ;;  %v1630_v61 = vpop.f32.mrb[20].mxu1  ;;  %v1976_v58 = vld [vmem:[%s3484_s8 + $0x18] sm:$0xff] }
 0x385   :  { %v1631_v62 = vadd.f32 %v1630_v61, %v1419_v44  ;;  %v1632_v63 = vpop.f32.mrb[21].mxu1 }
 0x386   :  { %v1633_v0 = vadd.f32 %v1632_v63, %v1423_v45  ;;  %v1634_v1 = vpop.f32.mrb[22].mxu1  ;;  %1875 = vmatprep.mubr.bf16.mxu1 %v1648_v60 }
 0x387   :  { %v1635_v3 = vadd.f32 %v1634_v1, %v1419_v44  ;;  %v1636_v4 = vpop.f32.mrb[23].mxu1  ;;  %1876 = vmatmul.mubr.bf16.vlgmr.msra.gmra.mrb[24].mxu1 %v1647_v59  ;;  %v1643_v6 = vmax.f32 %v1631_v62, 0.0 }
 0x388   :  { %v1637_v5 = vadd.f32 %v1636_v4, %v1423_v45  ;;  %v1644_v9 = vmax.f32 %v1633_v0, 0.0  ;;  %v1975_v45 = vld [vmem:[%s3484_s8 + $0x10] sm:$0xff]  ;;  %v1983_v4 = vunpack.c.l.bf16 %v1976_v58 }
 0x389   :  { %v1645_v8 = vmax.f32 %v1635_v3, 0.0  ;;  %v1981_v51 = vunpack.c.l.bf16 %v1975_v45  ;;  %v1982_v56 = vunpack.c.h.bf16 %v1975_v45 }
 0x38a   :  { %v1646_v10 = vmax.f32 %v1637_v5, 0.0 }
 0x38b   :  { %v1649_v11 = vpack.c.bf16 %v1645_v8, %v1643_v6 }
 0x38c   :  { %v1650_v12 = vpack.c.bf16 %v1646_v10, %v1644_v9  ;;  %v1984_v9 = vunpack.c.h.bf16 %v1976_v58 }
 0x38e   :  { %1885 = vmatprep.mubr.bf16.mxu1 %v1650_v12 }
 0x38f   :  { %1886 = vmatmul.mubr.bf16.gmra.mrb[28].mxu1 %v1649_v11 }
 0x390   :  { %1944 = vmatprep.mubr.bf16.mxu1 %v2671_v49 }
 0x45a   :  { %v1877_v13 = vpop.f32.mrb[24].mxu1 }
 0x45b   :  { %v1879_v14 = vpop.f32.mrb[25].mxu1 }
 0x45c   :  { %v1881_v15 = vpop.f32.mrb[26].mxu1 }
 0x45d   :  { %v1896_v16 = vpack.c.bf16 %v1881_v15, %v1877_v13  ;;  %v1883_v17 = vpop.f32.mrb[27].mxu1 }
 0x45e   :  { %v1897_v18 = vpack.c.bf16 %v1883_v17, %v1879_v14 }
 0x460   :  { %1912 = vmatprep.subr.bf16.mxu1 %v1897_v18 }
 0x461   :  { %1913 = vmatpush1.bf16.msra.mxu1 %v1896_v16 }
 0x462   :  { %v1887_v19 = vpop.f32.mrb[28].mxu1 }
 0x463   :  { %v1889_v20 = vpop.f32.mrb[29].mxu1 }
 0x464   :  { %v1891_v21 = vpop.f32.mrb[30].mxu1 }
 0x465   :  { %v1898_v22 = vpack.c.bf16 %v1891_v21, %v1887_v19  ;;  %v1893_v23 = vpop.f32.mrb[31].mxu1 }
 0x466   :  { %v1899_v24 = vpack.c.bf16 %v1893_v23, %v1889_v20 }
 0x468   :  { %1914 = vmatprep.subr.bf16.mxu1 %v1899_v24 }
 0x469   :  { %1915 = vmatpush1.bf16.msra.mxu1 %v1898_v22  ;;  %v2010_v22 = vld [vmem:[#allocation2] sm:$0x1] }
 0x46c   :  { %2264 = vmatmul.mubr.msk.bf16.vlgmr.msra.gmra.mrb[32].mxu1 %vm1310_vm0, %v3226_v2 }
 0x46d   :  { %1954 = vmatprep.mubr.bf16.mxu1 %v2671_v49  ;;  %v1974_v49 = vld [vmem:[%s3484_s8 + $0x8] sm:$0xff] }
 0x46e   :  { %v1979_v38 = vunpack.c.l.bf16 %v1974_v49  ;;  %v1980_v44 = vunpack.c.h.bf16 %v1974_v49 }
 0x474   :  { %2265 = vmatmul.mubr.msk.bf16.gmra.mrb[36].mxu1 %vm1310_vm0, %v3246_v7 }
 0x53f   :  { %v1946_v29 = vpop.f32.mrb[32].mxu1 }
 0x540   :  { %v1947_v2 = vadd.f32 %v1946_v29, %v1905_v26  ;;  %v1948_v7 = vpop.f32.mrb[33].mxu1 }
 0x541   :  { %v1949_v31 = vadd.f32 %v1948_v7, %v1909_v28  ;;  %v1950_v33 = vpop.f32.mrb[34].mxu1 }
 0x542   :  { %v1965_v34 = vmax.f32 %v1947_v2, 0.0  ;;  %v1951_v35 = vadd.f32 %v1950_v33, %v1905_v26  ;;  %v1952_v36 = vpop.f32.mrb[35].mxu1 }
 0x543   :  { %v1966_v37 = vmax.f32 %v1949_v31, 0.0  ;;  %v1953_v39 = vadd.f32 %v1952_v36, %v1909_v28 }
 0x544   :  { %v1985_v41 = vmul.f32 %v1977_v30, %v1965_v34  ;;  %v1967_v42 = vmax.f32 %v1951_v35, 0.0 }
 0x545   :  { %v1986_v40 = vmul.f32 %v1978_v32, %v1966_v37  ;;  %v1968_v43 = vmax.f32 %v1953_v39, 0.0 }
 0x546   :  { %v1987_v46 = vmul.f32 %v1979_v38, %v1967_v42 }
 0x547   :  { %v1993_v47 = vadd.f32 %v1986_v40, %v1985_v41  ;;  %v1956_v48 = vpop.f32.mrb[36].mxu1  ;;  %v1988_v54 = vmul.f32 %v1980_v44, %v1968_v43 }
 0x548   :  { %v1957_v50 = vadd.f32 %v1956_v48, %v1905_v26  ;;  %v1958_v52 = vpop.f32.mrb[37].mxu1 }
 0x549   :  { %v1994_v53 = vadd.f32 %v1993_v47, %v1987_v46  ;;  %v1959_v55 = vadd.f32 %v1958_v52, %v1909_v28  ;;  %v1960_v57 = vpop.f32.mrb[38].mxu1 }
 0x54a   :  { %v1969_v59 = vmax.f32 %v1957_v50, 0.0  ;;  %v1961_v60 = vadd.f32 %v1960_v57, %v1905_v26  ;;  %v1962_v61 = vpop.f32.mrb[39].mxu1 }
 0x54b   :  { %v1995_v62 = vadd.f32 %v1994_v53, %v1988_v54  ;;  %v1970_v63 = vmax.f32 %v1959_v55, 0.0  ;;  %v1963_v0 = vadd.f32 %v1962_v61, %v1909_v28 }
 0x54c   :  { %v1989_v1 = vmul.f32 %v1981_v51, %v1969_v59  ;;  %v1971_v3 = vmax.f32 %v1961_v60, 0.0 }
 0x54d   :  { %v1990_v5 = vmul.f32 %v1982_v56, %v1970_v63  ;;  %v1972_v8 = vmax.f32 %v1963_v0, 0.0 }
 0x54e   :  { %v1996_v6 = vadd.f32 %v1995_v62, %v1989_v1  ;;  %v1991_v10 = vmul.f32 %v1983_v4, %v1971_v3 }
 0x54f   :  { %v1992_v12 = vmul.f32 %v1984_v9, %v1972_v8 }
 0x550   :  { %v1997_v11 = vadd.f32 %v1996_v6, %v1990_v5 }
 0x552   :  { %v1998_v13 = vadd.f32 %v1997_v11, %v1991_v10 }
 0x554   :  { %v1999_v14 = vadd.f32 %v1998_v13, %v1992_v12 }
 0x556   :  { %2000 = vadd.xlane.f32.xlu0 %v1999_v14 }
 0x5e3   :  { %v2001_v15 = vpop.xlane.xlu0 %2000 }
 0x5e4   :  { %v2002_v16 = vrot.slane %v2001_v15, 4 }
 0x5e6   :  { %v2003_v17 = vadd.f32 %v2002_v16, %v2001_v15 }
 0x5e8   :  { %v2004_v18 = vrot.slane %v2003_v17, 2 }
 0x5ea   :  { %v2005_v19 = vadd.f32 %v2004_v18, %v2003_v17 }
 0x5ec   :  { %v2006_v20 = vrot.slane %v2005_v19, 1 }
 0x5ee   :  { %v2007_v21 = vadd.f32 %v2006_v20, %v2005_v19 }
 0x5f0   :  { %2299 = vpush %v2007_v21 }
 0x621   :  { %s2300_s8 = spop %2299 }
 0x622   :  { %v2009_v23 = vstv %s2300_s8 }
 0x623   :  { %v2011_v24 = vadd.f32 %v2010_v22, %v2009_v23 }
 0x625   :  { %v2266_v25 = vmul.f32 -1.442695, %v2011_v24 }
 0x627   :  { %2643 = vpow2.f32 %v2266_v25 }
 0x631   :  { %v2644_v26 = vpop.eup %2643 }
 0x632   :  { %v2015_v27 = vadd.f32 1.0, %v2644_v26 }
 0x634   :  { %2645 = vrcp.f32 %v2015_v27 }
 0x63e   :  { %v2646_v28 = vpop.eup %2645 }
 0x63f   :  { %2019 = vst.msk [vmem:[#allocation3] sm:$0x1] %vm2018_vm1, %v2646_v28 }
 0x640   :  { %2658 = shalt.err (!%p2655_p4)
}
 0x641   :  { %s2659_s9 = scalar_lea.hbm %s3486_s10, 16 }
 0x642   :  { %p2660_p5 = scmp.ne.s32.totalorder %s3486_s10, %s2659_s9  ;;  %p2663_p6 = scmp.lt.u32.totalorder %s2659_s9, %s3486_s10 }
 0x644   :  { %p2665_p7 = pnand %p2663_p6, %p2660_p5 }
 0x646   :  { %2668 = shalt.err (!%p2665_p7)
}
 0x647   :  { %2029 = dma.vmem_to_hbm [thread:$0]  %s2027_s19, 16, %s3486_s10, [#allocation4]  }
 0x648   :  { %2669 = dma.done.wait [#allocation4], 16  }
 0x649   :  { %2670 = vsyncadd [#allocation4], 4294967280 }
 0x64a   :  { %2033 = vsyncpa [#allocation4], 1 }

</bundles_post_ra>
